<compile_context>
chip_gen: v7x
topology: tpu7x:2x2x1
jax: 0.10.0
libtpu: 0.0.40
codegen_flags: <defaults>
</compile_context>

<pallas_src>
import functools

import jax
import jax.numpy as jnp
from jax import lax
from jax.experimental import pallas as pl
from jax.experimental.pallas import tpu as pltpu


# ----------------------------------------------------------------------------
# helpers
# ----------------------------------------------------------------------------
def _round_up(x, m):
    return (x + m - 1) // m * m


def _pick_divisor(dim, candidates):
    for t in candidates:
        if dim % t == 0:
            return t
    return None


# ----------------------------------------------------------------------------
# Pallas kernel: bf16 matmul with fused (scale, bias, activation) epilogue.
# ----------------------------------------------------------------------------
def _mm_fused_kernel(x_ref, w_ref, s_ref, b_ref, o_ref, *, act):
    # Single K step: no accumulator scratch, no zero-init, no read-modify-write.
    y = jnp.dot(x_ref[...], w_ref[...], preferred_element_type=jnp.float32)
    y = y * s_ref[...] + b_ref[...]
    if act == "relu":
        y = jnp.maximum(y, 0.0)
    elif act == "sigmoid":
        y = jax.nn.sigmoid(y)
    o_ref[...] = y.astype(o_ref.dtype)


def _mm_fused_acc_kernel(x_ref, w_ref, s_ref, b_ref, o_ref, acc_ref, *, act):
    k = pl.program_id(2)

    @pl.when(k == 0)
    def _():
        acc_ref[...] = jnp.zeros_like(acc_ref)

    acc_ref[...] += jnp.dot(x_ref[...], w_ref[...],
                            preferred_element_type=jnp.float32)

    @pl.when(k == pl.num_programs(2) - 1)
    def _():
        y = acc_ref[...] * s_ref[...] + b_ref[...]
        if act == "relu":
            y = jnp.maximum(y, 0.0)
        elif act == "sigmoid":
            y = jax.nn.sigmoid(y)
        o_ref[...] = y.astype(o_ref.dtype)


def matmul_scale_bias_act(x, w, scale, bias, act="none", out_dtype=jnp.float32):
    """act((x @ w) * scale + bias).  x/w feed the MXU as bf16, f32 accumulate."""
    M, K = x.shape
    Kw, N = w.shape
    assert K == Kw

    x = x.astype(jnp.bfloat16)
    w = w.astype(jnp.bfloat16)
    s2 = scale.astype(jnp.float32).reshape(1, N)
    b2 = bias.astype(jnp.float32).reshape(1, N)

    # --- M tiling: prefer >=2 parallel tiles (dual TensorCores on v7x); never
    # pad unless M has no 16-aligned divisor (bf16 sublane packing needs 16).
    if M <= 256:
        tm, Mp = M, M
    else:
        tm = _pick_divisor(M, (256, 512, 128, 64, 32, 16))
        if tm is None:                       # rare fallback
            Mp = _round_up(M, 256)
            x = jnp.pad(x, ((0, Mp - M), (0, 0)))
            tm = 256
        else:
            Mp = M

    # --- N tiling: weights / scale / bias are packed once at init, no padding.
    tn = N if N <= 512 else _pick_divisor(N, (512, 256, 128))
    assert tn is not None, "Cout must be <= 512 or a multiple of 128"

    # --- K tiling: a single deep K step whenever it fits in VMEM comfortably.
    if K <= 4096:
        tk, Kp = K, K
    else:
        tk = _pick_divisor(K, (4096, 2048, 1024, 512, 256, 128))
        if tk is None:                       # rare fallback
            Kp = _round_up(K, 2048)
            x = jnp.pad(x, ((0, 0), (0, Kp - K)))
            w = jnp.pad(w, ((0, Kp - K), (0, 0)))
            tk = 2048
        else:
            Kp = K

    if Kp == tk:
        out = pl.pallas_call(
            functools.partial(_mm_fused_kernel, act=act),
            out_shape=jax.ShapeDtypeStruct((Mp, N), out_dtype),
            grid_spec=pltpu.PrefetchScalarGridSpec(
                num_scalar_prefetch=0,
                grid=(Mp // tm, N // tn),
                in_specs=[
                    pl.BlockSpec((tm, Kp), lambda i, j: (i, 0)),
                    pl.BlockSpec((Kp, tn), lambda i, j: (0, j)),
                    pl.BlockSpec((1, tn), lambda i, j: (0, j)),
                    pl.BlockSpec((1, tn), lambda i, j: (0, j)),
                ],
                out_specs=pl.BlockSpec((tm, tn), lambda i, j: (i, j)),
            ),
            compiler_params=pltpu.CompilerParams(
                dimension_semantics=("parallel", "parallel")),
        )(x, w, s2, b2)
    else:
        out = pl.pallas_call(
            functools.partial(_mm_fused_acc_kernel, act=act),
            out_shape=jax.ShapeDtypeStruct((Mp, N), out_dtype),
            grid_spec=pltpu.PrefetchScalarGridSpec(
                num_scalar_prefetch=0,
                grid=(Mp // tm, N // tn, Kp // tk),
                in_specs=[
                    pl.BlockSpec((tm, tk), lambda i, j, k: (i, k)),
                    pl.BlockSpec((tk, tn), lambda i, j, k: (k, j)),
                    pl.BlockSpec((1, tn), lambda i, j, k: (0, j)),
                    pl.BlockSpec((1, tn), lambda i, j, k: (0, j)),
                ],
                out_specs=pl.BlockSpec((tm, tn), lambda i, j, k: (i, j)),
                scratch_shapes=[pltpu.VMEM((tm, tn), jnp.float32)],
            ),
            compiler_params=pltpu.CompilerParams(
                dimension_semantics=("parallel", "parallel", "arbitrary"),
                vmem_limit_bytes=48 * 1024 * 1024),
        )(x, w, s2, b2)

    return out[:M] if Mp != M else out


# ----------------------------------------------------------------------------
# Pallas kernel: read-once bilinear x2 upsample (align_corners=False).
# Fixed 0.25/0.75 weights with edge clamping; output is a lane-dense
# (B, H, 2, W, 2*C) slab that reshapes for free to (B, 2H, 2W, C).
# ----------------------------------------------------------------------------
def _upsample2x_kernel(x_ref, o_ref):
    x = x_ref[0]                                                  # (H, W, C)
    xl = jnp.concatenate([x[:, :1, :], x[:, :-1, :]], axis=1)     # col w-1 (clamp)
    xr = jnp.concatenate([x[:, 1:, :], x[:, -1:, :]], axis=1)     # col w+1 (clamp)
    we = 0.25 * xl + 0.75 * x                                     # output col 2w
    wo = 0.75 * x + 0.25 * xr                                     # output col 2w+1
    xw = jnp.concatenate([we, wo], axis=-1)                       # (H, W, 2C)
    xu = jnp.concatenate([xw[:1], xw[:-1]], axis=0)               # row h-1 (clamp)
    xd = jnp.concatenate([xw[1:], xw[-1:]], axis=0)               # row h+1 (clamp)
    o_ref[0, :, 0, :, :] = 0.25 * xu + 0.75 * xw                  # output row 2h
    o_ref[0, :, 1, :, :] = 0.75 * xw + 0.25 * xd                  # output row 2h+1


def upsample_bilinear_2x(x):
    """nn.Upsample(scale_factor=2, mode='bilinear', align_corners=False)."""
    B, H, W, C = x.shape
    out = pl.pallas_call(
        _upsample2x_kernel,
        out_shape=jax.ShapeDtypeStruct((B, H, 2, W, 2 * C), jnp.float32),
        grid_spec=pltpu.PrefetchScalarGridSpec(
            num_scalar_prefetch=0,
            grid=(B,),
            in_specs=[pl.BlockSpec((1, H, W, C), lambda b: (b, 0, 0, 0))],
            out_specs=pl.BlockSpec((1, H, 2, W, 2 * C),
                                   lambda b: (b, 0, 0, 0, 0)),
        ),
        compiler_params=pltpu.CompilerParams(dimension_semantics=("parallel",)),
    )(x.astype(jnp.float32))
    return out.reshape(B, 2 * H, 2 * W, C)      # pure reshape, no data movement


# ----------------------------------------------------------------------------
# conv glue (im2col) — plain-JAX patch extraction feeding the matmul kernel.
# ----------------------------------------------------------------------------
def _im2col3(x):
    """3x3, stride 1, pad 1 patches.  x: (N,H,W,C) bf16 -> (N*H*W, 9*C)."""
    # TODO(synk): patch extraction could move in-kernel via (kh,kw) grid axes
    # with offset index_maps; at these shapes the matmul weights dominate.
    N, H, W, C = x.shape
    xp = jnp.pad(x, ((0, 0), (1, 1), (1, 1), (0, 0)))
    cols = [xp[:, i:i + H, j:j + W, :] for i in range(3) for j in range(3)]
    return jnp.concatenate(cols, axis=-1).reshape(N * H * W, 9 * C), (N, H, W)


def conv3x3_bn_relu(x, packed, out_dtype=jnp.float32):
    """ConvBnop: Conv2d(3x3, pad=1) + BatchNorm + ReLU, BN/ReLU fused."""
    patches, (n, h, w) = _im2col3(x.astype(jnp.bfloat16))
    y = matmul_scale_bias_act(patches, packed['wm'], packed['scale'],
                              packed['bias'], act='relu', out_dtype=out_dtype)
    return y.reshape(n, h, w, -1)


def deconv4x4_s2_bn_relu(x, packed):
    """ConvTranspose2d(k=4, s=2, p=1) + BN + ReLU via the 4-phase (sub-pixel)
    decomposition: one 3x3-patch matmul producing all 4 output phases packed
    along lanes; the interleave back to (2H, 2W) is wrapper layout plumbing."""
    patches, (n, h, w) = _im2col3(x.astype(jnp.bfloat16))
    y = matmul_scale_bias_act(patches, packed['wm'], packed['scale'],
                              packed['bias'], act='relu',
                              out_dtype=jnp.float32)        # (n*h*w, 4*cout)
    cout = y.shape[-1] // 4          # STATIC (derived from array shape, jit-safe)
    y = y.reshape(n, h, w, 2, 2, cout)
    return jnp.transpose(y, (0, 1, 3, 2, 4, 5)).reshape(n, 2 * h, 2 * w, cout)


# ----------------------------------------------------------------------------
# parameter init + one-time weight packing (hoisted out of the forward)
# ----------------------------------------------------------------------------
def _make_conv(key, cin, cout, k):
    kw, kb = jax.random.split(key)
    bound = (6.0 / (cin * k * k)) ** 0.5
    w = jax.random.uniform(kw, (cout, cin, k, k), jnp.float32, -bound, bound)
    b = jax.random.uniform(kb, (cout,), jnp.float32, -0.05, 0.05)
    return w, b


def _make_deconv(key, cin, cout, k):
    kw, kb = jax.random.split(key)
    bound = (6.0 / (cin * k * k)) ** 0.5
    # PyTorch ConvTranspose2d weight layout: (in_channels, out_channels, kh, kw)
    w = jax.random.uniform(kw, (cin, cout, k, k), jnp.float32, -bound, bound)
    b = jax.random.uniform(kb, (cout,), jnp.float32, -0.05, 0.05)
    return w, b


def _make_bn(key, c):
    kg, kb, km, kv = jax.random.split(key, 4)
    return {'gamma': jax.random.uniform(kg, (c,), jnp.float32, 0.5, 1.5),
            'beta': jax.random.uniform(kb, (c,), jnp.float32, -0.2, 0.2),
            'mean': jax.random.uniform(km, (c,), jnp.float32, -0.2, 0.2),
            'var': jax.random.uniform(kv, (c,), jnp.float32, 0.5, 1.5),
            'eps': 1e-5}


def _fold_bn(conv_b, bn):
    # TODO(synk): BatchNorm is folded with running (inference) statistics;
    # training-mode batch statistics are not implemented.
    s = bn['gamma'] / jnp.sqrt(bn['var'] + bn['eps'])
    return s, (conv_b - bn['mean']) * s + bn['beta']


def _pack_conv3x3(w_pt, b, bn):
    """PyTorch (Cout,Cin,3,3) -> (9*Cin, Cout) bf16 matmul weight + folded BN."""
    cout, cin = w_pt.shape[0], w_pt.shape[1]
    wm = jnp.transpose(w_pt, (2, 3, 1, 0)).reshape(9 * cin, cout)
    sc, bias = _fold_bn(b, bn)
    return {'wm': wm.astype(jnp.bfloat16), 'scale': sc, 'bias': bias}


def _pack_deconv4x4(w_pt, b, bn):
    """PyTorch ConvTranspose2d(4,2,1) weight (Cin,Cout,4,4) -> a (9*Cin,4*Cout)
    matmul weight.  Output phase (r,s) of output pixel (2h+r, 2w+s) only sees
    input taps (h+i-1, w+j-1) with kernel entry (ky,kx)=(r+1-2(i-1), s+1-2(j-1))
    when those are in [0,4); other taps are zero.
    NOTE: only array leaves here — the dict is a jit argument; no Python ints
    (they would turn into tracers and break static reshapes)."""
    cin, cout = w_pt.shape[0], w_pt.shape[1]
    zero = jnp.zeros((cin, cout), jnp.float32)
    rows = []
    for i in range(3):                  # patch row tap  -> input row h + i - 1
        for j in range(3):              # patch col tap  -> input col w + j - 1
            phases = []
            for r in range(2):          # output row phase 2h + r
                for s in range(2):      # output col phase 2w + s
                    ky = r + 1 - 2 * (i - 1)
                    kx = s + 1 - 2 * (j - 1)
                    ok = (0 <= ky < 4) and (0 <= kx < 4)
                    phases.append(w_pt[:, :, ky, kx] if ok else zero)
            rows.append(jnp.concatenate(phases, axis=1))        # (cin, 4*cout)
    wmat = jnp.concatenate(rows, axis=0)                        # (9*cin, 4*cout)
    sc, bias = _fold_bn(b, bn)
    return {'wm': wmat.astype(jnp.bfloat16),
            'scale': jnp.tile(sc, 4), 'bias': jnp.tile(bias, 4)}


def init_decoder_params(key, in_channels, middle_channels, out_channels,
                        is_deconv=True):
    k1, k2, k3, k4 = jax.random.split(key, 4)
    if is_deconv:
        w1, b1 = _make_conv(k1, in_channels, middle_channels, 3)
        bn1 = _make_bn(k2, middle_channels)
        wd, bd = _make_deconv(k3, middle_channels, out_channels, 4)
        bn2 = _make_bn(k4, out_channels)
        raw = dict(w1=w1, b1=b1, bn1=bn1, wd=wd, bd=bd, bn2=bn2)
        packed = dict(conv1=_pack_conv3x3(w1, b1, bn1),
                      deconv=_pack_deconv4x4(wd, bd, bn2))
    else:
        w1, b1 = _make_conv(k1, in_channels, out_channels, 3)
        bn1 = _make_bn(k2, out_channels)
        raw = dict(w1=w1, b1=b1, bn1=bn1)
        packed = dict(conv1=_pack_conv3x3(w1, b1, bn1))
    return packed, raw


# ----------------------------------------------------------------------------
# DecoderBlDBD forward
# ----------------------------------------------------------------------------
def decoder_bldbd_forward(packed, x_nchw, *, is_deconv=True):
    x = jnp.transpose(x_nchw, (0, 2, 3, 1)).astype(jnp.float32)   # -> NHWC
    if is_deconv:
        h = conv3x3_bn_relu(x, packed['conv1'], out_dtype=jnp.bfloat16)
        y = deconv4x4_s2_bn_relu(h, packed['deconv'])
    else:
        h = conv3x3_bn_relu(x, packed['conv1'], out_dtype=jnp.float32)
        y = upsample_bilinear_2x(h)
    return jnp.transpose(y, (0, 3, 1, 2))                         # -> NCHW


# ----------------------------------------------------------------------------
# pure-JAX references (for in-script correctness checks)
# ----------------------------------------------------------------------------
def _ref_bn_relu(y, bn):
    s = bn['gamma'] / jnp.sqrt(bn['var'] + bn['eps'])
    return jnp.maximum((y - bn['mean']) * s + bn['beta'], 0.0)


def _ref_conv3x3_bn_relu(x, w_pt, b, bn):
    y = lax.conv_general_dilated(
        x, jnp.transpose(w_pt, (2, 3, 1, 0)), (1, 1), [(1, 1), (1, 1)],
        dimension_numbers=('NHWC', 'HWIO', 'NHWC'),
        precision=lax.Precision.HIGHEST) + b
    return _ref_bn_relu(y, bn)


def _ref_deconv4x4_bn_relu(x, w_pt, b, bn):
    wf = jnp.transpose(w_pt[:, :, ::-1, ::-1], (2, 3, 0, 1))   # HWIO, flipped
    y = lax.conv_general_dilated(
        x, wf, (1, 1), [(2, 2), (2, 2)], lhs_dilation=(2, 2),
        dimension_numbers=('NHWC', 'HWIO', 'NHWC'),
        precision=lax.Precision.HIGHEST) + b
    return _ref_bn_relu(y, bn)


def _ref_upsample2x(x):
    N, H, W, C = x.shape

    def src(out_size, in_size):
        s = jnp.clip((jnp.arange(out_size, dtype=jnp.float32) + 0.5) / 2.0 - 0.5,
                     0.0, in_size - 1.0)
        i0 = jnp.floor(s).astype(jnp.int32)
        i1 = jnp.minimum(i0 + 1, in_size - 1)
        return i0, i1, s - i0.astype(jnp.float32)

    y0, y1, wy = src(2 * H, H)
    x0, x1, wx = src(2 * W, W)
    wxb = wx[None, None, :, None]
    top = x[:, y0][:, :, x0] * (1 - wxb) + x[:, y0][:, :, x1] * wxb
    bot = x[:, y1][:, :, x0] * (1 - wxb) + x[:, y1][:, :, x1] * wxb
    wyb = wy[None, :, None, None]
    return top * (1 - wyb) + bot * wyb


# ----------------------------------------------------------------------------
if __name__ == "__main__":
    key = jax.random.PRNGKey(0)
    kp1, kp2, kx = jax.random.split(key, 3)

    B, Cin, H, W = 2, 64, 16, 16
    Cmid, Cout = 64, 32
    x = jax.random.normal(kx, (B, Cin, H, W), jnp.float32)       # NCHW input
    x_nhwc = jnp.transpose(x, (0, 2, 3, 1))

    # --- path 1: is_deconv=True (module default) -----------------------------
    packed_d, raw_d = init_decoder_params(kp1, Cin, Cmid, Cout, is_deconv=True)
    fwd_d = jax.jit(functools.partial(decoder_bldbd_forward, is_deconv=True))
    y_d = jax.block_until_ready(fwd_d(packed_d, x))
    assert y_d.shape == (B, Cout, 2 * H, 2 * W), y_d.shape
    assert bool(jnp.all(jnp.isfinite(y_d)))

    ref_d = _ref_deconv4x4_bn_relu(
        _ref_conv3x3_bn_relu(x_nhwc, raw_d['w1'], raw_d['b1'], raw_d['bn1']),
        raw_d['wd'], raw_d['bd'], raw_d['bn2'])
    ref_d = jnp.transpose(ref_d, (0, 3, 1, 2))
    err = float(jnp.max(jnp.abs(y_d - ref_d)))
    scl = float(jnp.max(jnp.abs(ref_d)))
    assert err <= 0.04 * scl + 0.05, (err, scl)

    # --- path 2: is_deconv=False (ConvBnop + bilinear x2 upsample) ------------
    packed_u, raw_u = init_decoder_params(kp2, Cin, Cmid, Cout, is_deconv=False)
    fwd_u = jax.jit(functools.partial(decoder_bldbd_forward, is_deconv=False))
    y_u = jax.block_until_ready(fwd_u(packed_u, x))
    assert y_u.shape == (B, Cout, 2 * H, 2 * W), y_u.shape
    assert bool(jnp.all(jnp.isfinite(y_u)))

    ref_u = _ref_upsample2x(
        _ref_conv3x3_bn_relu(x_nhwc, raw_u['w1'], raw_u['b1'], raw_u['bn1']))
    ref_u = jnp.transpose(ref_u, (0, 3, 1, 2))
    err = float(jnp.max(jnp.abs(y_u - ref_u)))
    scl = float(jnp.max(jnp.abs(ref_u)))
    assert err <= 0.04 * scl + 0.05, (err, scl)

    print("KERNEL_OK")
</pallas_src>

<mosaic_0001>
module attributes {stable_mosaic.version = 11 : i64} {
  func.func @_mm_fused_kernel(%arg0: i32, %arg1: i32, %arg2: memref<256x576xbf16, #tpu.memory_space<vmem>>, %arg3: memref<576x64xbf16, #tpu.memory_space<vmem>>, %arg4: memref<1x64xf32, #tpu.memory_space<vmem>>, %arg5: memref<1x64xf32, #tpu.memory_space<vmem>>, %arg6: memref<256x64xbf16, #tpu.memory_space<vmem>>) attributes {dimension_semantics = [#tpu.dimension_semantics<parallel>, #tpu.dimension_semantics<parallel>], iteration_bounds = array<i64: 2, 1>, scalar_prefetch = 0 : i64, scratch_operands = 0 : i64, tpu.core_type = #tpu.core_type<tc>, window_params = [{transform_indices = @transform_0, window_bounds = array<i64: 256, 576>}, {transform_indices = @transform_1, window_bounds = array<i64: 576, 64>}, {transform_indices = @transform_2, window_bounds = array<i64: 1, 64>}, {transform_indices = @transform_3, window_bounds = array<i64: 1, 64>}, {transform_indices = @transform_4, window_bounds = array<i64: 256, 64>}]} {
    %c0 = arith.constant 0 : index
    %c0_0 = arith.constant 0 : index
    %0 = vector.load %arg2[%c0, %c0_0] : memref<256x576xbf16, #tpu.memory_space<vmem>>, vector<256x576xbf16>
    %c0_1 = arith.constant 0 : index
    %c0_2 = arith.constant 0 : index
    %1 = vector.load %arg3[%c0_1, %c0_2] : memref<576x64xbf16, #tpu.memory_space<vmem>>, vector<576x64xbf16>
    %cst = arith.constant dense<0.000000e+00> : vector<256x64xf32>
    %2 = tpu.matmul %0, %1, %cst {dimension_numbers = #tpu.dot_dimension_numbers<[1], [0], [0], [1], [0, 0, 1, 1], [], []>} : vector<256x576xbf16>, vector<576x64xbf16>, vector<256x64xf32> -> vector<256x64xf32>
    %c0_3 = arith.constant 0 : index
    %c0_4 = arith.constant 0 : index
    %3 = vector.load %arg4[%c0_3, %c0_4] : memref<1x64xf32, #tpu.memory_space<vmem>>, vector<1x64xf32>
    %4 = vector.broadcast %3 : vector<1x64xf32> to vector<256x64xf32>
    %5 = arith.mulf %2, %4 : vector<256x64xf32>
    %c0_5 = arith.constant 0 : index
    %c0_6 = arith.constant 0 : index
    %6 = vector.load %arg5[%c0_5, %c0_6] : memref<1x64xf32, #tpu.memory_space<vmem>>, vector<1x64xf32>
    %7 = vector.broadcast %6 : vector<1x64xf32> to vector<256x64xf32>
    %8 = arith.addf %5, %7 : vector<256x64xf32>
    %cst_7 = arith.constant 0.000000e+00 : f32
    %9 = vector.broadcast %cst_7 : f32 to vector<256x64xf32>
    %10 = arith.maximumf %8, %9 : vector<256x64xf32>
    %11 = arith.truncf %10 : vector<256x64xf32> to vector<256x64xbf16>
    %c0_8 = arith.constant 0 : index
    %c0_9 = arith.constant 0 : index
    %12 = vector.load %arg6[%c0_8, %c0_9] : memref<256x64xbf16, #tpu.memory_space<vmem>>, vector<256x64xbf16>
    tpu.vector_store %arg6[%c0_8, %c0_9], %11 {strides = array<i32>} : memref<256x64xbf16, #tpu.memory_space<vmem>>, vector<256x64xbf16>,
    return
  }
  func.func @transform_0(%arg0: i32, %arg1: i32) -> (i32, i32) {
    %c0_i32 = arith.constant 0 : i32
    %c0_i32_0 = arith.constant 0 : i32
    return %arg0, %c0_i32 : i32, i32
  }
  func.func @transform_1(%arg0: i32, %arg1: i32) -> (i32, i32) {
    %c0_i32 = arith.constant 0 : i32
    %c0_i32_0 = arith.constant 0 : i32
    return %c0_i32, %arg1 : i32, i32
  }
  func.func @transform_2(%arg0: i32, %arg1: i32) -> (i32, i32) {
    %c0_i32 = arith.constant 0 : i32
    %c0_i32_0 = arith.constant 0 : i32
    return %c0_i32, %arg1 : i32, i32
  }
  func.func @transform_3(%arg0: i32, %arg1: i32) -> (i32, i32) {
    %c0_i32 = arith.constant 0 : i32
    %c0_i32_0 = arith.constant 0 : i32
    return %c0_i32, %arg1 : i32, i32
  }
  func.func @transform_4(%arg0: i32, %arg1: i32) -> (i32, i32) {
    %c0_i32 = arith.constant 0 : i32
    return %arg0, %arg1 : i32, i32
  }
}

module attributes {stable_mosaic.version = 11 : i64} {
  func.func @_mm_fused_kernel(%arg0: i32, %arg1: i32, %arg2: memref<256x576xbf16, #tpu.memory_space<vmem>>, %arg3: memref<576x128xbf16, #tpu.memory_space<vmem>>, %arg4: memref<1x128xf32, #tpu.memory_space<vmem>>, %arg5: memref<1x128xf32, #tpu.memory_space<vmem>>, %arg6: memref<256x128xf32, #tpu.memory_space<vmem>>) attributes {dimension_semantics = [#tpu.dimension_semantics<parallel>, #tpu.dimension_semantics<parallel>], iteration_bounds = array<i64: 2, 1>, scalar_prefetch = 0 : i64, scratch_operands = 0 : i64, tpu.core_type = #tpu.core_type<tc>, window_params = [{transform_indices = @transform_0, window_bounds = array<i64: 256, 576>}, {transform_indices = @transform_1, window_bounds = array<i64: 576, 128>}, {transform_indices = @transform_2, window_bounds = array<i64: 1, 128>}, {transform_indices = @transform_3, window_bounds = array<i64: 1, 128>}, {transform_indices = @transform_4, window_bounds = array<i64: 256, 128>}]} {
    %c0 = arith.constant 0 : index
    %c0_0 = arith.constant 0 : index
    %0 = vector.load %arg2[%c0, %c0_0] : memref<256x576xbf16, #tpu.memory_space<vmem>>, vector<256x576xbf16>
    %c0_1 = arith.constant 0 : index
    %c0_2 = arith.constant 0 : index
    %1 = vector.load %arg3[%c0_1, %c0_2] : memref<576x128xbf16, #tpu.memory_space<vmem>>, vector<576x128xbf16>
    %cst = arith.constant dense<0.000000e+00> : vector<256x128xf32>
    %2 = tpu.matmul %0, %1, %cst {dimension_numbers = #tpu.dot_dimension_numbers<[1], [0], [0], [1], [0, 0, 1, 1], [], []>} : vector<256x576xbf16>, vector<576x128xbf16>, vector<256x128xf32> -> vector<256x128xf32>
    %c0_3 = arith.constant 0 : index
    %c0_4 = arith.constant 0 : index
    %3 = vector.load %arg4[%c0_3, %c0_4] : memref<1x128xf32, #tpu.memory_space<vmem>>, vector<1x128xf32>
    %4 = vector.broadcast %3 : vector<1x128xf32> to vector<256x128xf32>
    %5 = arith.mulf %2, %4 : vector<256x128xf32>
    %c0_5 = arith.constant 0 : index
    %c0_6 = arith.constant 0 : index
    %6 = vector.load %arg5[%c0_5, %c0_6] : memref<1x128xf32, #tpu.memory_space<vmem>>, vector<1x128xf32>
    %7 = vector.broadcast %6 : vector<1x128xf32> to vector<256x128xf32>
    %8 = arith.addf %5, %7 : vector<256x128xf32>
    %cst_7 = arith.constant 0.000000e+00 : f32
    %9 = vector.broadcast %cst_7 : f32 to vector<256x128xf32>
    %10 = arith.maximumf %8, %9 : vector<256x128xf32>
    %c0_8 = arith.constant 0 : index
    %c0_9 = arith.constant 0 : index
    %11 = vector.load %arg6[%c0_8, %c0_9] : memref<256x128xf32, #tpu.memory_space<vmem>>, vector<256x128xf32>
    tpu.vector_store %arg6[%c0_8, %c0_9], %10 {strides = array<i32>} : memref<256x128xf32, #tpu.memory_space<vmem>>, vector<256x128xf32>,
    return
  }
  func.func @transform_0(%arg0: i32, %arg1: i32) -> (i32, i32) {
    %c0_i32 = arith.constant 0 : i32
    %c0_i32_0 = arith.constant 0 : i32
    return %arg0, %c0_i32 : i32, i32
  }
  func.func @transform_1(%arg0: i32, %arg1: i32) -> (i32, i32) {
    %c0_i32 = arith.constant 0 : i32
    %c0_i32_0 = arith.constant 0 : i32
    return %c0_i32, %arg1 : i32, i32
  }
  func.func @transform_2(%arg0: i32, %arg1: i32) -> (i32, i32) {
    %c0_i32 = arith.constant 0 : i32
    %c0_i32_0 = arith.constant 0 : i32
    return %c0_i32, %arg1 : i32, i32
  }
  func.func @transform_3(%arg0: i32, %arg1: i32) -> (i32, i32) {
    %c0_i32 = arith.constant 0 : i32
    %c0_i32_0 = arith.constant 0 : i32
    return %c0_i32, %arg1 : i32, i32
  }
  func.func @transform_4(%arg0: i32, %arg1: i32) -> (i32, i32) {
    %c0_i32 = arith.constant 0 : i32
    return %arg0, %arg1 : i32, i32
  }
}

</mosaic_0001>

<bundles_post_ra>
// kernel: decoder_bldbd_forward.2
= control target key start
LH: loop header
LB: loop body
LE: loop exit
PB: predicated region body
PF: predicated region fallthrough
CT: control target
= control target key end

     0   :  { %s2705_s15 = smov 0   ;;  %s2707_s16 = smov 0   ;;  %s3205_s0 = inlined_call_operand.vmem [shape: bf16[512,576], index: 0, kind: input, shape index: {}]   ;;  %s3206_s1 = inlined_call_operand.vmem [shape: bf16[576,64], index: 1, kind: input, shape index: {}]   ;;  %s3207_s2 = inlined_call_operand.vmem [shape: f32[1,64], index: 2, kind: input, shape index: {}]   ;;  %s3208_s3 = inlined_call_operand.vmem [shape: f32[1,64], index: 3, kind: input, shape index: {}]   ;;  %s3209_s4 = inlined_call_operand.vmem [shape: bf16[512,64], index: 4, kind: output, shape index: {}]  }
   0x1   :  { %s2709_s17 = smov 0  }
   0x2 LB: > { %s26_s18 = sadd.s32 1, %s2674_s16  ;;  %p1978_p0 = scmp.ge.s32.totalorder %s2678_s17, 1  ;;  %s2678_s17 = sphi %s2709_s17, %s14_s17   ;;  %s2674_s16 = sphi %s2707_s16, %s3211_s16   ;;  %s2670_s15 = sphi %s2705_s15, %s3210_s15  }
   0x3   : > { %p28_p1 = scmp.ge.s32.totalorder %s26_s18, 2  ;;  %p203_p2 = scmp.lt.s32.totalorder %s2678_s17, 3 }
   0x5   : > { %s3213_s18 = smov (%p28_p1, %s26_s18), 0  ;;  %p204_p3 = pnand %p1978_p0, %p203_p2 }
   0x6   : > { %v2508_v0 = vld [vmem:[%s3206_s1 + $0x40] sm:$0xff] (!%p204_p3)   ;;  %s1979_s21 = sshll.u32 (!%p204_p3), %s2670_s15, 5  ;;  %v2510_v2 = vld [vmem:[%s3206_s1 + $0x48] sm:$0xff] (!%p204_p3)   ;;  %v2512_v4 = vld [vmem:[%s3206_s1 + $0x50] sm:$0xff] (!%p204_p3)   ;;  %vm1054_vm0 = vcmask (!%p204_p3), 523264   ;;  %vm1824_vm1 = vcmask (!%p204_p3), 519168  }
   0x7   : > { %207 = sbr.rel (%p204_p3) target bundleno = 421 (0x1a5), region = 36  ;;  %v2509_v1 = vld [vmem:[%s3206_s1] sm:$0xff] (!%p204_p3)   ;;  %2183 = vmatprep.subr.bf16.mxu0 (!%p204_p3), %v2508_v0  ;;  %2467 = vmatprep.subr.bf16.mxu1 (!%p204_p3), %v2508_v0  ;;  %p244_p4 = scmp.lt.s32.totalorder (!%p204_p3), %s1979_s21, 63  ;;  %v2511_v3 = vld [vmem:[%s3206_s1 + $0x8] sm:$0xff] (!%p204_p3)   ;;  %v2513_v5 = vld [vmem:[%s3206_s1 + $0x10] sm:$0xff] (!%p204_p3)  }
   0x8   : > { %2184 = vmatpush3.bf16.msra.mxu0 (!%p204_p3), %v2509_v1  ;;  %2475 = vmatpush3.bf16.msra.mxu1 (!%p204_p3), %v2509_v1  ;;  %v2514_v6 = vld [vmem:[%s3206_s1 + $0x58] sm:$0xff] (!%p204_p3)   ;;  %v2516_v8 = vld [vmem:[%s3206_s1 + $0x60] sm:$0xff] (!%p204_p3)   ;;  %v2518_v10 = vld [vmem:[%s3206_s1 + $0x68] sm:$0xff] (!%p204_p3)  }
   0x9   : > { %2185 = vmatprep.subr.bf16.mxu0 (!%p204_p3), %v2510_v2  ;;  %2468 = vmatprep.subr.bf16.mxu1 (!%p204_p3), %v2510_v2  ;;  %v2515_v7 = vld [vmem:[%s3206_s1 + $0x18] sm:$0xff] (!%p204_p3)   ;;  %v2517_v9 = vld [vmem:[%s3206_s1 + $0x20] sm:$0xff] (!%p204_p3)   ;;  %v2519_v13 = vld [vmem:[%s3206_s1 + $0x28] sm:$0xff] (!%p204_p3)  }
   0xa   : > { %v2520_v14 = vld [vmem:[%s3206_s1 + $0x70] sm:$0xff] (!%p204_p3)   ;;  %v2522_v16 = vld [vmem:[%s3206_s1 + $0x78] sm:$0xff] (!%p204_p3)   ;;  %v2530_v18 = vld [vmem:[%s3206_s1 + $0xc0] sm:$0xff] (!%p204_p3)  }
   0xb   : > { %v2521_v15 = vld [vmem:[%s3206_s1 + $0x30] sm:$0xff] (!%p204_p3)   ;;  %v2523_v17 = vld [vmem:[%s3206_s1 + $0x38] sm:$0xff] (!%p204_p3)   ;;  %v2533_v19 = vld [vmem:[%s3206_s1 + $0x100] sm:$0xff] (!%p204_p3)  }
   0xc   : > { %2186 = vmatpush3.bf16.msra.mxu0 (!%p204_p3), %v2511_v3  ;;  %2476 = vmatpush3.bf16.msra.mxu1 (!%p204_p3), %v2511_v3  ;;  %v2531_v22 = vld [vmem:[%s3206_s1 + $0x80] sm:$0xff] (!%p204_p3)   ;;  %v2532_v23 = vld [vmem:[%s3206_s1 + $0xc8] sm:$0xff] (!%p204_p3)   ;;  %v2541_v28 = vld [vmem:[%s3206_s1 + $0xd0] sm:$0xff] (!%p204_p3)  }
   0xd   : > { %2187 = vmatprep.subr.bf16.mxu0 (!%p204_p3), %v2512_v4  ;;  %2469 = vmatprep.subr.bf16.mxu1 (!%p204_p3), %v2512_v4  ;;  %v2534_v26 = vld [vmem:[%s3206_s1 + $0x88] sm:$0xff] (!%p204_p3)   ;;  %v2542_v30 = vld [vmem:[%s3206_s1 + $0x90] sm:$0xff] (!%p204_p3)   ;;  %v2543_v31 = vld [vmem:[%s3206_s1 + $0xd8] sm:$0xff] (!%p204_p3)  }
   0xe   : > { %s3215_s21 = smov (!%p244_p4, %s1979_s21), 63  ;;  %v2544_v34 = vld [vmem:[%s3206_s1 + $0x98] sm:$0xff]   ;;  %v2564_v35 = vld [vmem:[%s3206_s1 + $0x108] sm:$0xff]   ;;  %v2551_v37 = vld [vmem:[%s3206_s1 + $0xe0] sm:$0xff]  }
   0xf   : > { %s2483_s8 = smul.u32 20, %s3215_s21  ;;  %v2552_v39 = vld [vmem:[%s3206_s1 + $0xa0] sm:$0xff]   ;;  %v2553_v40 = vld [vmem:[%s3206_s1 + $0xe8] sm:$0xff]   ;;  %v2561_v46 = vld [vmem:[%s3206_s1 + $0xf0] sm:$0xff]   ;;  %s1982_s9 = sshll.u32 %s3215_s21, 2 }
  0x10   : > { %2188 = vmatpush3.bf16.msra.mxu0 %v2513_v5  ;;  %2477 = vmatpush3.bf16.msra.mxu1 %v2513_v5  ;;  %v2554_v43 = vld [vmem:[%s3206_s1 + $0xa8] sm:$0xff]   ;;  %v2584_v47 = vld [vmem:[%s3206_s1 + $0x110] sm:$0xff]   ;;  %v2563_v49 = vld [vmem:[%s3206_s1 + $0xf8] sm:$0xff]   ;;  %s3030_s12 = scalar_lea.vmem %s3209_s4, %s1982_s9 }
  0x11   : > { %2189 = vmatprep.subr.bf16.mxu0 %v2514_v6  ;;  %2470 = vmatprep.subr.bf16.mxu1 %v2514_v6  ;;  %s2756_s15 = scalar_lea.vmem %s3205_s0, %s2483_s8  ;;  %v2562_v48 = vld [vmem:[%s3206_s1 + $0xb0] sm:$0xff]   ;;  %v2565_v52 = vld [vmem:[%s3206_s1 + $0xb8] sm:$0xff]  }
  0x12   : > { %v2526_v11 = vld [vmem:[%s2756_s15 + $0x4] ss:$20 sps:$4 sm:$0xff]   ;;  %v2524_v20 = vld [vmem:[%s2756_s15] ss:$20 sps:$4 sm:$0xff]   ;;  %v2539_v27 = vld [vmem:[%s2756_s15 + $0x28] ss:$20 sps:$4 sm:$0xff]  }
  0x13   : > { %v2529_v12 = vld [vmem:[%s2756_s15 + $0x1e4] ss:$20 sps:$4 sm:$0xff]   ;;  %1135 = vmatprep.mubr.bf16.mxu0 %v2526_v11  ;;  %v2527_v21 = vld [vmem:[%s2756_s15 + $0x1e0] ss:$20 sps:$4 sm:$0xff]   ;;  %v2540_v29 = vld [vmem:[%s2756_s15 + $0x208] ss:$20 sps:$4 sm:$0xff]  }
  0x14   : > { %2190 = vmatpush3.bf16.msra.mxu0 %v2515_v7  ;;  %2478 = vmatpush3.bf16.msra.mxu1 %v2515_v7  ;;  %v2535_v24 = vld [vmem:[%s2756_s15 + $0x2c] ss:$20 sps:$4 sm:$0xff]   ;;  %v2545_v32 = vld [vmem:[%s2756_s15 + $0x54] ss:$20 sps:$4 sm:$0xff]   ;;  %v2549_v36 = vld [vmem:[%s2756_s15 + $0x50] ss:$20 sps:$4 sm:$0xff]  }
  0x15   : > { %2191 = vmatprep.subr.bf16.mxu0 %v2516_v8  ;;  %2471 = vmatprep.subr.bf16.mxu1 %v2516_v8  ;;  %v2537_v25 = vld [vmem:[%s2756_s15 + $0x20c] ss:$20 sps:$4 sm:$0xff]   ;;  %v2547_v33 = vld [vmem:[%s2756_s15 + $0x234] ss:$20 sps:$4 sm:$0xff]   ;;  %v2550_v38 = vld [vmem:[%s2756_s15 + $0x230] ss:$20 sps:$4 sm:$0xff]  }
  0x16   : > { %1231 = vmatprep.mubr.bf16.mxu1 %v2529_v12  ;;  %v2555_v41 = vld [vmem:[%s2756_s15 + $0x7c] ss:$20 sps:$4 sm:$0xff]   ;;  %v2559_v44 = vld [vmem:[%s2756_s15 + $0x78] ss:$20 sps:$4 sm:$0xff]   ;;  %v2571_v54 = vld [vmem:[%s2756_s15 + $0xa0] ss:$20 sps:$4 sm:$0xff]  }
  0x17   : > { %v2557_v42 = vld [vmem:[%s2756_s15 + $0x25c] ss:$20 sps:$4 sm:$0xff]   ;;  %v2560_v45 = vld [vmem:[%s2756_s15 + $0x258] ss:$20 sps:$4 sm:$0xff]   ;;  %v2574_v57 = vld [vmem:[%s2756_s15 + $0x34] ss:$20 sps:$4 sm:$0xff]  }
  0x18   : > { %2192 = vmatpush3.bf16.msra.mxu0 %v2517_v9  ;;  %2479 = vmatpush3.bf16.msra.mxu1 %v2517_v9  ;;  %v2566_v50 = vld [vmem:[%s2756_s15 + $0xa4] ss:$20 sps:$4 sm:$0xff]   ;;  %v2570_v51 = vld [vmem:[%s2756_s15 + $0xc] ss:$20 sps:$4 sm:$0xff]   ;;  %v2568_v53 = vld [vmem:[%s2756_s15 + $0x8] ss:$20 sps:$4 sm:$0xff]  }
  0x19   : > { %2193 = vmatprep.subr.bf16.mxu0 %v2518_v10  ;;  %2472 = vmatprep.subr.bf16.mxu1 %v2518_v10  ;;  %v2572_v55 = vld [vmem:[%s2756_s15 + $0xcc] ss:$20 sps:$4 sm:$0xff]   ;;  %v2603_v56 = vld [vmem:[%s3206_s1 + $0x118] sm:$0xff]   ;;  %v2577_v59 = vld [vmem:[%s2756_s15 + $0x30] ss:$20 sps:$4 sm:$0xff]  }
  0x1a   : > { %v2576_v58 = vld [vmem:[%s2756_s15 + $0xc8] ss:$20 sps:$4 sm:$0xff]   ;;  %v2582_v62 = vld [vmem:[%s2756_s15 + $0xf0] ss:$20 sps:$4 sm:$0xff]   ;;  %v2583_v63 = vld [vmem:[%s2756_s15 + $0x58] ss:$20 sps:$4 sm:$0xff]  }
  0x1b   : > { %v2578_v60 = vld [vmem:[%s2756_s15 + $0xf4] ss:$20 sps:$4 sm:$0xff]   ;;  %v2580_v61 = vld [vmem:[%s2756_s15 + $0x5c] ss:$20 sps:$4 sm:$0xff]   ;;  %v2587_v1 = vld [vmem:[%s2756_s15 + $0x84] ss:$20 sps:$4 sm:$0xff]  }
  0x1c   : > { %2194 = vmatpush3.bf16.msra.mxu0 %v2519_v13  ;;  %2480 = vmatpush3.bf16.msra.mxu1 %v2519_v13  ;;  %v2585_v0 = vld [vmem:[%s2756_s15 + $0x11c] ss:$20 sps:$4 sm:$0xff]   ;;  %v2589_v2 = vld [vmem:[%s2756_s15 + $0x118] ss:$20 sps:$4 sm:$0xff]   ;;  %v2590_v3 = vld [vmem:[%s2756_s15 + $0x80] ss:$20 sps:$4 sm:$0xff]  }
  0x1d   : > { %2195 = vmatprep.subr.bf16.mxu0 %v2520_v14  ;;  %2473 = vmatprep.subr.bf16.mxu1 %v2520_v14  ;;  %v2591_v4 = vld [vmem:[%s2756_s15 + $0x144] ss:$20 sps:$4 sm:$0xff]   ;;  %v2593_v5 = vld [vmem:[%s2756_s15 + $0xac] ss:$20 sps:$4 sm:$0xff]   ;;  %v2596_v7 = vld [vmem:[%s2756_s15 + $0xa8] ss:$20 sps:$4 sm:$0xff]  }
  0x1e   : > { %v2595_v6 = vld [vmem:[%s2756_s15 + $0x140] ss:$20 sps:$4 sm:$0xff]   ;;  %v2601_v10 = vld [vmem:[%s2756_s15 + $0x168] ss:$20 sps:$4 sm:$0xff]   ;;  %v2602_v11 = vld [vmem:[%s2756_s15 + $0xd0] ss:$20 sps:$4 sm:$0xff]  }
  0x1f   : > { %v2597_v8 = vld [vmem:[%s2756_s15 + $0x16c] ss:$20 sps:$4 sm:$0xff]   ;;  %v2599_v9 = vld [vmem:[%s2756_s15 + $0xd4] ss:$20 sps:$4 sm:$0xff]   ;;  %v2606_v13 = vld [vmem:[%s2756_s15 + $0xfc] ss:$20 sps:$4 sm:$0xff]  }
  0x20   : > { %2196 = vmatpush3.bf16.msra.mxu0 %v2521_v15  ;;  %2481 = vmatpush3.bf16.msra.mxu1 %v2521_v15  ;;  %v2604_v12 = vld [vmem:[%s2756_s15 + $0x194] ss:$20 sps:$4 sm:$0xff]   ;;  %v2608_v14 = vld [vmem:[%s2756_s15 + $0x190] ss:$20 sps:$4 sm:$0xff]   ;;  %v2609_v15 = vld [vmem:[%s2756_s15 + $0xf8] ss:$20 sps:$4 sm:$0xff]  }
  0x21   : > { %2197 = vmatprep.subr.bf16.mxu0 %v2522_v16  ;;  %2474 = vmatprep.subr.bf16.mxu1 %v2522_v16  ;;  %v2610_v16 = vld [vmem:[%s2756_s15 + $0x1bc] ss:$20 sps:$4 sm:$0xff]  }
  0x24   : > { %2198 = vmatpush3.bf16.msra.mxu0 %v2523_v17  ;;  %2482 = vmatpush3.bf16.msra.mxu1 %v2523_v17  ;;  %v2612_v17 = vld [vmem:[%s2756_s15 + $0x124] ss:$20 sps:$4 sm:$0xff]  }
  0x25   : > { %2295 = vmatprep.subr.bf16.mxu1 %v2530_v18  ;;  %2427 = vmatprep.subr.bf16.mxu0 %v2533_v19  ;;  %v2614_v18 = vld [vmem:[%s2756_s15 + $0x1b8] ss:$20 sps:$4 sm:$0xff]  }
  0x27   : > { %1136 = vmatmul.mubr.bf16.vlgmr.msra.gmra.mrb[0].mxu0 %v2524_v20  ;;  %1232 = vmatmul.mubr.bf16.vlgmr.msra.gmra.mrb[0].mxu1 %v2527_v21  ;;  %v2616_v20 = vld [vmem:[%s2756_s15 + $0x14c] ss:$20 sps:$4 sm:$0xff]   ;;  %v2618_v21 = vld [vmem:[%s2756_s15 + $0x10] ss:$20 sps:$4 sm:$0xff]  }
  0x28   : > { %2296 = vmatpush3.bf16.msra.mxu1 %v2531_v22  ;;  %2428 = vmatpush3.bf16.msra.mxu0 %v2533_v19  ;;  %v2615_v19 = vld [vmem:[%s2756_s15 + $0x120] ss:$20 sps:$4 sm:$0xff]   ;;  %v2619_v22 = vld [vmem:[%s2756_s15 + $0x148] ss:$20 sps:$4 sm:$0xff]  }
  0x29   : > { %2297 = vmatprep.subr.bf16.mxu1 %v2532_v23  ;;  %1143 = vmatprep.mubr.bf16.mxu0 %v2535_v24  ;;  %v2620_v23 = vld [vmem:[%s2756_s15 + $0x38] ss:$20 sps:$4 sm:$0xff]   ;;  %v2621_v24 = vld [vmem:[%s2756_s15 + $0x174] ss:$20 sps:$4 sm:$0xff]  }
  0x2a   : > { %1239 = vmatprep.mubr.bf16.mxu1 %v2537_v25  ;;  %2429 = vmatprep.subr.bf16.mxu0 %v2564_v35  ;;  %v2623_v25 = vld [vmem:[%s2756_s15 + $0x60] ss:$20 sps:$4 sm:$0xff]  }
  0x2c   : > { %2298 = vmatpush3.bf16.msra.mxu1 %v2534_v26  ;;  %2430 = vmatpush3.bf16.msra.mxu0 %v2564_v35  ;;  %v2624_v26 = vld [vmem:[%s2756_s15 + $0x170] ss:$20 sps:$4 sm:$0xff]   ;;  %v2635_v35 = vld [vmem:[%s2756_s15 + $0x128] ss:$20 sps:$4 sm:$0xff]  }
  0x2d   : > { %2299 = vmatprep.subr.bf16.mxu1 %v2541_v28  ;;  %2431 = vmatprep.subr.bf16.mxu0 %v2584_v47  ;;  %v2626_v28 = vld [vmem:[%s2756_s15 + $0x19c] ss:$20 sps:$4 sm:$0xff]  }
  0x2f   : > { %1144 = vmatmul.mubr.bf16.gmra.mrb[4].mxu0 %v2539_v27  ;;  %1240 = vmatmul.mubr.bf16.gmra.mrb[4].mxu1 %v2540_v29  ;;  %v2625_v27 = vld [vmem:[%s2756_s15 + $0x88] ss:$20 sps:$4 sm:$0xff]   ;;  %v2628_v29 = vld [vmem:[%s2756_s15 + $0xb0] ss:$20 sps:$4 sm:$0xff]  }
  0x30   : > { %2300 = vmatpush3.bf16.msra.mxu1 %v2542_v30  ;;  %1151 = vmatprep.mubr.bf16.mxu0 %v2545_v32  ;;  %v2629_v30 = vld [vmem:[%s2756_s15 + $0x198] ss:$20 sps:$4 sm:$0xff]  }
  0x31   : > { %2301 = vmatprep.subr.bf16.mxu1 %v2543_v31  ;;  %1247 = vmatprep.mubr.bf16.mxu1 %v2547_v33  ;;  %v2630_v31 = vld [vmem:[%s2756_s15 + $0xd8] ss:$20 sps:$4 sm:$0xff]   ;;  %v2633_v33 = vld [vmem:[%s2756_s15 + $0x100] ss:$20 sps:$4 sm:$0xff]  }
  0x32   : > { %2432 = vmatpush3.bf16.msra.mxu0 %v2584_v47  ;;  %v2631_v32 = vld [vmem:[%s2756_s15 + $0x1c4] ss:$20 sps:$4 sm:$0xff]  }
  0x33   : > { %2433 = vmatprep.subr.bf16.mxu0 %v2603_v56  ;;  %v2650_v47 = vld [vmem:[%s2756_s15 + $0x218] ss:$20 sps:$4 sm:$0xff]  }
  0x34   : > { %2302 = vmatpush3.bf16.msra.mxu1 %v2544_v34  ;;  %v2634_v34 = vld [vmem:[%s2756_s15 + $0x1c0] ss:$20 sps:$4 sm:$0xff]  }
  0x35   : > { %2303 = vmatprep.subr.bf16.mxu1 %v2551_v37  ;;  %v2638_v37 = vld [vmem:[%s2756_s15 + $0x150] ss:$20 sps:$4 sm:$0xff]  }
  0x36   : > { %2434 = vmatpush3.bf16.msra.mxu0 %v2603_v56 }
  0x37   : > { %1152 = vmatmul.mubr.bf16.gmra.mrb[8].mxu0 %v2549_v36  ;;  %1248 = vmatmul.mubr.bf16.gmra.mrb[8].mxu1 %v2550_v38  ;;  %v2636_v36 = vld [vmem:[%s2756_s15 + $0x1ec] ss:$20 sps:$4 sm:$0xff]   ;;  %v2639_v38 = vld [vmem:[%s2756_s15 + $0x1e8] ss:$20 sps:$4 sm:$0xff]  }
  0x38   : > { %2304 = vmatpush3.bf16.msra.mxu1 %v2552_v39  ;;  %1159 = vmatprep.mubr.bf16.mxu0 %v2555_v41  ;;  %v2640_v39 = vld [vmem:[%s2756_s15 + $0x178] ss:$20 sps:$4 sm:$0xff]   ;;  %v2643_v41 = vld [vmem:[%s2756_s15 + $0x1a0] ss:$20 sps:$4 sm:$0xff]  }
  0x39   : > { %2305 = vmatprep.subr.bf16.mxu1 %v2553_v40  ;;  %1255 = vmatprep.mubr.bf16.mxu1 %v2557_v42  ;;  %v2641_v40 = vld [vmem:[%s2756_s15 + $0x214] ss:$20 sps:$4 sm:$0xff]   ;;  %v2644_v42 = vld [vmem:[%s2756_s15 + $0x210] ss:$20 sps:$4 sm:$0xff]  }
  0x3c   : > { %2306 = vmatpush3.bf16.msra.mxu1 %v2554_v43  ;;  %v2645_v43 = vld [vmem:[%s2756_s15 + $0x1c8] ss:$20 sps:$4 sm:$0xff]  }
  0x3d   : > { %2307 = vmatprep.subr.bf16.mxu1 %v2561_v46  ;;  %v2649_v46 = vld [vmem:[%s2756_s15 + $0x238] ss:$20 sps:$4 sm:$0xff]  }
  0x3f   : > { %1160 = vmatmul.mubr.bf16.gmra.mrb[12].mxu0 %v2559_v44  ;;  %1256 = vmatmul.mubr.bf16.gmra.mrb[12].mxu1 %v2560_v45  ;;  %v2646_v44 = vld [vmem:[%s2756_s15 + $0x23c] ss:$20 sps:$4 sm:$0xff]  }
  0x40   : > { %2308 = vmatpush3.bf16.msra.mxu1 %v2562_v48  ;;  %1167 = vmatprep.mubr.bf16.mxu0 %v2566_v50  ;;  %v2648_v45 = vld [vmem:[%s2756_s15 + $0x1f0] ss:$20 sps:$4 sm:$0xff]   ;;  %v2654_v50 = vld [vmem:[%s2756_s15 + $0x260] ss:$20 sps:$4 sm:$0xff]  }
  0x41   : > { %2309 = vmatprep.subr.bf16.mxu1 %v2563_v49  ;;  %1296 = vmatprep.mubr.bf16.mxu1 %v2570_v51  ;;  %v2651_v48 = vld [vmem:[%s2756_s15 + $0x264] ss:$20 sps:$4 sm:$0xff]   ;;  %v2653_v49 = vld [vmem:[%s2756_s15 + $0x240] ss:$20 sps:$4 sm:$0xff]   ;;  %v2655_v51 = vld [vmem:[%s2756_s15 + $0x268] ss:$20 sps:$4 sm:$0xff]  }
  0x44   : > { %2310 = vmatpush3.bf16.msra.mxu1 %v2565_v52 }
  0x47   : > { %1168 = vmatmul.mubr.bf16.gmra.mrb[16].mxu0 %v2571_v54  ;;  %1297 = vmatmul.mubr.bf16.vlgmr.msra.gmra.mrb[16].mxu1 %v2568_v53 }
  0x48   : > { %1175 = vmatprep.mubr.bf16.mxu0 %v2572_v55  ;;  %1304 = vmatprep.mubr.bf16.mxu1 %v2574_v57 }
  0x4f   : > { %1176 = vmatmul.mubr.bf16.gmra.mrb[20].mxu0 %v2576_v58  ;;  %1305 = vmatmul.mubr.bf16.gmra.mrb[20].mxu1 %v2577_v59 }
  0x50   : > { %1183 = vmatprep.mubr.bf16.mxu0 %v2578_v60  ;;  %1312 = vmatprep.mubr.bf16.mxu1 %v2580_v61 }
  0x57   : > { %1184 = vmatmul.mubr.bf16.gmra.mrb[24].mxu0 %v2582_v62  ;;  %1313 = vmatmul.mubr.bf16.gmra.mrb[24].mxu1 %v2583_v63 }
  0x58   : > { %1191 = vmatprep.mubr.bf16.mxu0 %v2585_v0  ;;  %1320 = vmatprep.mubr.bf16.mxu1 %v2587_v1 }
  0x5f   : > { %1192 = vmatmul.mubr.bf16.gmra.mrb[28].mxu0 %v2589_v2  ;;  %1321 = vmatmul.mubr.bf16.gmra.mrb[28].mxu1 %v2590_v3 }
  0x60   : > { %1199 = vmatprep.mubr.bf16.mxu0 %v2591_v4  ;;  %1328 = vmatprep.mubr.bf16.mxu1 %v2593_v5 }
  0x67   : > { %1200 = vmatmul.mubr.bf16.gmra.mrb[32].mxu0 %v2595_v6  ;;  %1329 = vmatmul.mubr.bf16.gmra.mrb[32].mxu1 %v2596_v7 }
  0x68   : > { %1207 = vmatprep.mubr.bf16.mxu0 %v2597_v8  ;;  %1336 = vmatprep.mubr.bf16.mxu1 %v2599_v9 }
  0x6f   : > { %1208 = vmatmul.mubr.bf16.gmra.mrb[36].mxu0 %v2601_v10  ;;  %1337 = vmatmul.mubr.bf16.gmra.mrb[36].mxu1 %v2602_v11 }
  0x70   : > { %1215 = vmatprep.mubr.bf16.mxu0 %v2604_v12  ;;  %1344 = vmatprep.mubr.bf16.mxu1 %v2606_v13 }
  0x77   : > { %1216 = vmatmul.mubr.bf16.gmra.mrb[40].mxu0 %v2608_v14  ;;  %1345 = vmatmul.mubr.bf16.gmra.mrb[40].mxu1 %v2609_v15 }
  0x78   : > { %1223 = vmatprep.mubr.bf16.mxu0 %v2610_v16  ;;  %1352 = vmatprep.mubr.bf16.mxu1 %v2612_v17 }
  0x7f   : > { %1224 = vmatmul.mubr.bf16.gmra.mrb[44].mxu0 %v2614_v18  ;;  %1353 = vmatmul.mubr.bf16.gmra.mrb[44].mxu1 %v2615_v19 }
  0x80   : > { %1360 = vmatprep.mubr.bf16.mxu1 %v2616_v20  ;;  %2435 = vmatprep.mubr.msk.bf16.mxu0 %vm1054_vm0, %v2618_v21 }
  0x87   : > { %1361 = vmatmul.mubr.bf16.gmra.mrb[48].mxu1 %v2619_v22  ;;  %2436 = vmatmul.mubr.msk.bf16.vlgmr.msra.gmra.mrb[48].mxu0 %vm1054_vm0, %v2620_v23 }
  0x88   : > { %1368 = vmatprep.mubr.bf16.mxu1 %v2621_v24  ;;  %2439 = vmatprep.mubr.msk.bf16.mxu0 %vm1054_vm0, %v2623_v25 }
  0x8f   : > { %1369 = vmatmul.mubr.bf16.gmra.mrb[52].mxu1 %v2624_v26  ;;  %2440 = vmatmul.mubr.msk.bf16.gmra.mrb[52].mxu0 %vm1054_vm0, %v2625_v27 }
  0x90   : > { %1376 = vmatprep.mubr.bf16.mxu1 %v2626_v28  ;;  %2443 = vmatprep.mubr.msk.bf16.mxu0 %vm1054_vm0, %v2628_v29 }
  0x97   : > { %1377 = vmatmul.mubr.bf16.gmra.mrb[56].mxu1 %v2629_v30  ;;  %2444 = vmatmul.mubr.msk.bf16.gmra.mrb[56].mxu0 %vm1054_vm0, %v2630_v31 }
  0x98   : > { %1384 = vmatprep.mubr.bf16.mxu1 %v2631_v32  ;;  %2447 = vmatprep.mubr.msk.bf16.mxu0 %vm1054_vm0, %v2633_v33 }
  0x9f   : > { %1385 = vmatmul.mubr.bf16.gmra.mrb[60].mxu1 %v2634_v34  ;;  %2448 = vmatmul.mubr.msk.bf16.gmra.mrb[60].mxu0 %vm1054_vm0, %v2635_v35 }
  0xa0   : > { %1392 = vmatprep.mubr.bf16.mxu1 %v2636_v36  ;;  %2451 = vmatprep.mubr.msk.bf16.mxu0 %vm1054_vm0, %v2638_v37 }
  0xa7   : > { %1393 = vmatmul.mubr.bf16.gmra.mrb[64].mxu1 %v2639_v38  ;;  %2452 = vmatmul.mubr.msk.bf16.gmra.mrb[64].mxu0 %vm1054_vm0, %v2640_v39 }
  0xa8   : > { %1400 = vmatprep.mubr.bf16.mxu1 %v2641_v40  ;;  %2455 = vmatprep.mubr.msk.bf16.mxu0 %vm1054_vm0, %v2643_v41 }
  0xaf   : > { %1401 = vmatmul.mubr.bf16.gmra.mrb[68].mxu1 %v2644_v42  ;;  %2456 = vmatmul.mubr.msk.bf16.gmra.mrb[68].mxu0 %vm1054_vm0, %v2645_v43 }
  0xb0   : > { %1408 = vmatprep.mubr.bf16.mxu1 %v2646_v44  ;;  %2459 = vmatprep.mubr.msk.bf16.mxu0 %vm1054_vm0, %v2648_v45 }
  0xb7   : > { %1409 = vmatmul.mubr.bf16.gmra.mrb[72].mxu1 %v2649_v46  ;;  %2460 = vmatmul.mubr.msk.bf16.gmra.mrb[72].mxu0 %vm1054_vm0, %v2650_v47 }
  0xb8   : > { %1416 = vmatprep.mubr.bf16.mxu1 %v2651_v48  ;;  %2463 = vmatprep.mubr.msk.bf16.mxu0 %vm1054_vm0, %v2653_v49 }
  0xbf   : > { %1417 = vmatmul.mubr.bf16.gmra.mrb[76].mxu1 %v2654_v50  ;;  %2464 = vmatmul.mubr.msk.bf16.gmra.mrb[76].mxu0 %vm1054_vm0, %v2655_v51 }
  0xfa   : > { %v2271_v52 = vpop.f32.mrb[0].mxu1  ;;  %v2199_v53 = vpop.f32.mrb[0].mxu0 }
  0xfb   : > { %v2272_v54 = vpop.f32.mrb[1].mxu1  ;;  %v2200_v55 = vpop.f32.mrb[1].mxu0 }
  0xfc   : > { %v2935_v56 = vadd.f32 %v2272_v54, %v2271_v52  ;;  %v2274_v57 = vpop.f32.mrb[2].mxu1  ;;  %v2201_v58 = vadd.f32 %v2200_v55, %v2199_v53  ;;  %v2202_v59 = vpop.f32.mrb[2].mxu0 }
  0xfd   : > { %v2275_v60 = vpop.f32.mrb[3].mxu1  ;;  %v2203_v61 = vpop.f32.mrb[3].mxu0 }
  0xfe   : > { %v2937_v62 = vadd.f32 %v2275_v60, %v2274_v57  ;;  %v2204_v63 = vadd.f32 %v2203_v61, %v2202_v59 }
 0x102   : > { %v2277_v0 = vpop.f32.mrb[4].mxu1  ;;  %v2205_v1 = vpop.f32.mrb[4].mxu0 }
 0x103   : > { %v2278_v2 = vpop.f32.mrb[5].mxu1  ;;  %v2206_v3 = vpop.f32.mrb[5].mxu0 }
 0x104   : > { %v2939_v4 = vadd.f32 %v2278_v2, %v2277_v0  ;;  %v2280_v5 = vpop.f32.mrb[6].mxu1  ;;  %v2207_v6 = vadd.f32 %v2206_v3, %v2205_v1  ;;  %v2208_v7 = vpop.f32.mrb[6].mxu0 }
 0x105   : > { %v2281_v8 = vpop.f32.mrb[7].mxu1  ;;  %v2209_v9 = vpop.f32.mrb[7].mxu0 }
 0x106   : > { %v2941_v10 = vadd.f32 %v2281_v8, %v2280_v5  ;;  %v2210_v11 = vadd.f32 %v2209_v9, %v2208_v7 }
 0x10a   : > { %v2283_v12 = vpop.f32.mrb[8].mxu1  ;;  %v2211_v13 = vpop.f32.mrb[8].mxu0 }
 0x10b   : > { %v2284_v14 = vpop.f32.mrb[9].mxu1  ;;  %v2212_v15 = vpop.f32.mrb[9].mxu0 }
 0x10c   : > { %v2943_v16 = vadd.f32 %v2284_v14, %v2283_v12  ;;  %v2286_v17 = vpop.f32.mrb[10].mxu1  ;;  %v2213_v18 = vadd.f32 %v2212_v15, %v2211_v13  ;;  %v2214_v19 = vpop.f32.mrb[10].mxu0 }
 0x10d   : > { %v2287_v20 = vpop.f32.mrb[11].mxu1  ;;  %v2215_v21 = vpop.f32.mrb[11].mxu0 }
 0x10e   : > { %v2945_v22 = vadd.f32 %v2287_v20, %v2286_v17  ;;  %v2216_v23 = vadd.f32 %v2215_v21, %v2214_v19 }
 0x112   : > { %v2289_v24 = vpop.f32.mrb[12].mxu1  ;;  %v2217_v25 = vpop.f32.mrb[12].mxu0 }
 0x113   : > { %v2290_v26 = vpop.f32.mrb[13].mxu1  ;;  %v2218_v27 = vpop.f32.mrb[13].mxu0 }
 0x114   : > { %v2947_v28 = vadd.f32 %v2290_v26, %v2289_v24  ;;  %v2292_v29 = vpop.f32.mrb[14].mxu1  ;;  %v2219_v30 = vadd.f32 %v2218_v27, %v2217_v25  ;;  %v2220_v31 = vpop.f32.mrb[14].mxu0 }
 0x115   : > { %v2293_v32 = vpop.f32.mrb[15].mxu1  ;;  %v2221_v33 = vpop.f32.mrb[15].mxu0 }
 0x116   : > { %v2949_v34 = vadd.f32 %v2293_v32, %v2292_v29  ;;  %v2222_v35 = vadd.f32 %v2221_v33, %v2220_v31 }
 0x11a   : > { %v2311_v36 = vpop.f32.mrb[16].mxu1  ;;  %v2223_v37 = vpop.f32.mrb[16].mxu0 }
 0x11b   : > { %v2312_v38 = vpop.f32.mrb[17].mxu1  ;;  %v2224_v39 = vpop.f32.mrb[17].mxu0 }
 0x11c   : > { %v2313_v40 = vadd.f32 %v2312_v38, %v2311_v36  ;;  %v2314_v41 = vpop.f32.mrb[18].mxu1  ;;  %v2225_v42 = vadd.f32 %v2224_v39, %v2223_v37  ;;  %v2226_v43 = vpop.f32.mrb[18].mxu0 }
 0x11d   : > { %v2315_v44 = vpop.f32.mrb[19].mxu1  ;;  %v2227_v45 = vpop.f32.mrb[19].mxu0 }
 0x11e   : > { %v2316_v46 = vadd.f32 %v2315_v44, %v2314_v41  ;;  %v2228_v47 = vadd.f32 %v2227_v45, %v2226_v43  ;;  %v2951_v48 = vadd.f32 %v2313_v40, %v2201_v58 }
 0x120   : > { %v2953_v49 = vadd.f32 %v2316_v46, %v2204_v63 }
 0x122   : > { %v2317_v50 = vpop.f32.mrb[20].mxu1  ;;  %v2229_v51 = vpop.f32.mrb[20].mxu0 }
 0x123   : > { %v2318_v52 = vpop.f32.mrb[21].mxu1  ;;  %v2230_v53 = vpop.f32.mrb[21].mxu0 }
 0x124   : > { %v2319_v54 = vadd.f32 %v2318_v52, %v2317_v50  ;;  %v2320_v55 = vpop.f32.mrb[22].mxu1  ;;  %v2231_v57 = vadd.f32 %v2230_v53, %v2229_v51  ;;  %v2232_v59 = vpop.f32.mrb[22].mxu0 }
 0x125   : > { %v2321_v60 = vpop.f32.mrb[23].mxu1  ;;  %v2233_v61 = vpop.f32.mrb[23].mxu0 }
 0x126   : > { %v2322_v0 = vadd.f32 %v2321_v60, %v2320_v55  ;;  %v2234_v1 = vadd.f32 %v2233_v61, %v2232_v59  ;;  %v2955_v2 = vadd.f32 %v2319_v54, %v2207_v6 }
 0x128   : > { %v2957_v3 = vadd.f32 %v2322_v0, %v2210_v11 }
 0x12a   : > { %v2323_v58 = vpop.f32.mrb[24].mxu1  ;;  %v2235_v5 = vpop.f32.mrb[24].mxu0 }
 0x12b   : > { %v2324_v63 = vpop.f32.mrb[25].mxu1  ;;  %v2236_v7 = vpop.f32.mrb[25].mxu0 }
 0x12c   : > { %v2325_v8 = vadd.f32 %v2324_v63, %v2323_v58  ;;  %v2326_v9 = vpop.f32.mrb[26].mxu1  ;;  %v2237_v12 = vadd.f32 %v2236_v7, %v2235_v5  ;;  %v2238_v13 = vpop.f32.mrb[26].mxu0 }
 0x12d   : > { %v2327_v14 = vpop.f32.mrb[27].mxu1  ;;  %v2239_v15 = vpop.f32.mrb[27].mxu0 }
 0x12e   : > { %v2328_v17 = vadd.f32 %v2327_v14, %v2326_v9  ;;  %v2240_v19 = vadd.f32 %v2239_v15, %v2238_v13  ;;  %v2959_v20 = vadd.f32 %v2325_v8, %v2213_v18 }
 0x130   : > { %v2961_v21 = vadd.f32 %v2328_v17, %v2216_v23 }
 0x132   : > { %v2329_v6 = vpop.f32.mrb[28].mxu1  ;;  %v2241_v24 = vpop.f32.mrb[28].mxu0 }
 0x133   : > { %v2330_v11 = vpop.f32.mrb[29].mxu1  ;;  %v2242_v25 = vpop.f32.mrb[29].mxu0 }
 0x134   : > { %v2331_v26 = vadd.f32 %v2330_v11, %v2329_v6  ;;  %v2332_v27 = vpop.f32.mrb[30].mxu1  ;;  %v2243_v29 = vadd.f32 %v2242_v25, %v2241_v24  ;;  %v2244_v31 = vpop.f32.mrb[30].mxu0 }
 0x135   : > { %v2333_v32 = vpop.f32.mrb[31].mxu1  ;;  %v2245_v33 = vpop.f32.mrb[31].mxu0 }
 0x136   : > { %v2334_v36 = vadd.f32 %v2333_v32, %v2332_v27  ;;  %v2246_v37 = vadd.f32 %v2245_v33, %v2244_v31  ;;  %v2963_v38 = vadd.f32 %v2331_v26, %v2219_v30 }
 0x138   : > { %v2965_v39 = vadd.f32 %v2334_v36, %v2222_v35 }
 0x13a   : > { %v2335_v18 = vpop.f32.mrb[32].mxu1  ;;  %v2247_v40 = vpop.f32.mrb[32].mxu0 }
 0x13b   : > { %v2336_v23 = vpop.f32.mrb[33].mxu1  ;;  %v2248_v41 = vpop.f32.mrb[33].mxu0 }
 0x13c   : > { %v2337_v43 = vadd.f32 %v2336_v23, %v2335_v18  ;;  %v2338_v44 = vpop.f32.mrb[34].mxu1  ;;  %v2967_v45 = vadd.f32 %v2248_v41, %v2247_v40  ;;  %v2250_v46 = vpop.f32.mrb[34].mxu0 }
 0x13d   : > { %v2339_v50 = vpop.f32.mrb[35].mxu1  ;;  %v2251_v51 = vpop.f32.mrb[35].mxu0 }
 0x13e   : > { %v2340_v52 = vadd.f32 %v2339_v50, %v2338_v44  ;;  %v2969_v53 = vadd.f32 %v2251_v51, %v2250_v46  ;;  %v2971_v54 = vadd.f32 %v2337_v43, %v2225_v42 }
 0x140   : > { %v2973_v30 = vadd.f32 %v2340_v52, %v2228_v47 }
 0x142   : > { %v2341_v35 = vpop.f32.mrb[36].mxu1  ;;  %v2253_v55 = vpop.f32.mrb[36].mxu0 }
 0x143   : > { %v2342_v59 = vpop.f32.mrb[37].mxu1  ;;  %v2254_v60 = vpop.f32.mrb[37].mxu0 }
 0x144   : > { %v2343_v61 = vadd.f32 %v2342_v59, %v2341_v35  ;;  %v2344_v0 = vpop.f32.mrb[38].mxu1  ;;  %v2975_v58 = vadd.f32 %v2254_v60, %v2253_v55  ;;  %v2256_v5 = vpop.f32.mrb[38].mxu0  ;;  %v3002_v59 = vld [vmem:[%s3207_s2] ss:$0 sm:$0xff] }
 0x145   : > { %v2345_v63 = vpop.f32.mrb[39].mxu1  ;;  %v2257_v7 = vpop.f32.mrb[39].mxu0 }
 0x146   : > { %v2346_v8 = vadd.f32 %v2345_v63, %v2344_v0  ;;  %v2977_v9 = vadd.f32 %v2257_v7, %v2256_v5  ;;  %v2979_v13 = vadd.f32 %v2343_v61, %v2231_v57  ;;  %v3008_v5 = vld [vmem:[%s3208_s3] ss:$0 sm:$0xff] }
 0x148   : > { %v2981_v42 = vadd.f32 %v2346_v8, %v2234_v1 }
 0x14a   : > { %v2347_v47 = vpop.f32.mrb[40].mxu1  ;;  %v2259_v14 = vpop.f32.mrb[40].mxu0 }
 0x14b   : > { %v2348_v15 = vpop.f32.mrb[41].mxu1  ;;  %v2260_v17 = vpop.f32.mrb[41].mxu0 }
 0x14c   : > { %v2349_v6 = vadd.f32 %v2348_v15, %v2347_v47  ;;  %v2350_v24 = vpop.f32.mrb[42].mxu1  ;;  %v2983_v11 = vadd.f32 %v2260_v17, %v2259_v14  ;;  %v2262_v25 = vpop.f32.mrb[42].mxu0 }
 0x14d   : > { %v2351_v26 = vpop.f32.mrb[43].mxu1  ;;  %v2263_v27 = vpop.f32.mrb[43].mxu0 }
 0x14e   : > { %v2352_v31 = vadd.f32 %v2351_v26, %v2350_v24  ;;  %v2985_v32 = vadd.f32 %v2263_v27, %v2262_v25  ;;  %v2987_v33 = vadd.f32 %v2349_v6, %v2237_v12 }
 0x150   : > { %v2989_v57 = vadd.f32 %v2352_v31, %v2240_v19 }
 0x152   : > { %v2353_v1 = vpop.f32.mrb[44].mxu1  ;;  %v2265_v36 = vpop.f32.mrb[44].mxu0 }
 0x153   : > { %v2354_v18 = vpop.f32.mrb[45].mxu1  ;;  %v2266_v40 = vpop.f32.mrb[45].mxu0 }
 0x154   : > { %v2355_v23 = vadd.f32 %v2354_v18, %v2353_v1  ;;  %v2356_v41 = vpop.f32.mrb[46].mxu1  ;;  %v2991_v43 = vadd.f32 %v2266_v40, %v2265_v36  ;;  %v2268_v44 = vpop.f32.mrb[46].mxu0 }
 0x155   : > { %v2357_v46 = vpop.f32.mrb[47].mxu1  ;;  %v2269_v50 = vpop.f32.mrb[47].mxu0 }
 0x156   : > { %v2358_v51 = vadd.f32 %v2357_v46, %v2356_v41  ;;  %v2993_v52 = vadd.f32 %v2269_v50, %v2268_v44  ;;  %v2995_v35 = vadd.f32 %v2355_v23, %v2243_v29 }
 0x158   : > { %v2997_v12 = vadd.f32 %v2358_v51, %v2246_v37 }
 0x15a   : > { %v2359_v19 = vpop.f32.mrb[48].mxu1  ;;  %v2437_v55 = vpop.f32.mrb[48].mxu0 }
 0x15b   : > { %v1468_v60 = vadd.f32 %v2437_v55, %v2955_v2  ;;  %v2360_v61 = vpop.f32.mrb[49].mxu1  ;;  %v1459_v0 = vpop.f32.mrb[49].mxu0 }
 0x15c   : > { %v2361_v29 = vadd.f32 %v2360_v61, %v2359_v19  ;;  %v1460_v37 = vadd.f32 %v1459_v0, %v2951_v48  ;;  %v2362_v63 = vpop.f32.mrb[50].mxu1  ;;  %v2438_v7 = vpop.f32.mrb[50].mxu0 }
 0x15d   : > { %v1595_v8 = vmul.f32 %v3002_v59, %v1468_v60  ;;  %v1471_v47 = vadd.f32 %v2438_v7, %v2957_v3  ;;  %v2363_v14 = vpop.f32.mrb[51].mxu1  ;;  %v1462_v15 = vpop.f32.mrb[51].mxu0 }
 0x15e   : > { %v1593_v2 = vmul.f32 %v3002_v59, %v1460_v37  ;;  %v2364_v17 = vadd.f32 %v2363_v14, %v2362_v63  ;;  %v1463_v6 = vadd.f32 %v1462_v15, %v2953_v49  ;;  %v3016_v24 = vadd.f32 %v2361_v29, %v2967_v45 }
 0x15f   : > { %v1634_v25 = vadd.f32 %v3008_v5, %v1595_v8  ;;  %v1596_v48 = vmul.f32 %v3002_v59, %v1471_v47 }
 0x160   : > { %v1632_v26 = vadd.f32 %v3008_v5, %v1593_v2  ;;  %v1594_v27 = vmul.f32 %v3002_v59, %v1463_v6  ;;  %v3024_v3 = vadd.f32 %v2364_v17, %v2969_v53 }
 0x161   : > { %v1666_v31 = vmax.f32 %v1634_v25, 0.0  ;;  %v1635_v1 = vadd.f32 %v3008_v5, %v1596_v48 }
 0x162   : > { %v1664_v49 = vmax.f32 %v1632_v26, 0.0  ;;  %v1633_v45 = vadd.f32 %v3008_v5, %v1594_v27  ;;  %v2365_v36 = vpop.f32.mrb[52].mxu1  ;;  %v2441_v18 = vpop.f32.mrb[52].mxu0 }
 0x163   : > { %v2153_v40 = vpack.c.bf16 %v1666_v31, %v1666_v31  ;;  %v1667_v23 = vmax.f32 %v1635_v1, 0.0  ;;  %v1484_v53 = vadd.f32 %v2441_v18, %v2963_v38  ;;  %v2366_v41 = vpop.f32.mrb[53].mxu1  ;;  %v1475_v44 = vpop.f32.mrb[53].mxu0 }
 0x164   : > { %v2151_v46 = vpack.c.bf16 %v1664_v49, %v1664_v49  ;;  %v1665_v50 = vmax.f32 %v1633_v45, 0.0  ;;  %v2367_v51 = vadd.f32 %v2366_v41, %v2365_v36  ;;  %v1476_v19 = vadd.f32 %v1475_v44, %v2959_v20  ;;  %v2368_v55 = vpop.f32.mrb[54].mxu1  ;;  %v2442_v60 = vpop.f32.mrb[54].mxu0 }
 0x165   : > { %1827 = vst.msk [vmem:[%s3030_s12 + $0x8] sm:$0xf] %vm1824_vm1, %v2153_v40  ;;  %v2154_v61 = vpack.c.bf16 %v1667_v23, %v1667_v23  ;;  %v1599_v0 = vmul.f32 %v3002_v59, %v1484_v53  ;;  %v1487_v29 = vadd.f32 %v2442_v60, %v2965_v39  ;;  %v2369_v37 = vpop.f32.mrb[55].mxu1  ;;  %v1478_v38 = vpop.f32.mrb[55].mxu0 }
 0x166   : > { %1825 = vst.msk [vmem:[%s3030_s12] sm:$0xf] %vm1824_vm1, %v2151_v46  ;;  %v2152_v63 = vpack.c.bf16 %v1665_v50, %v1665_v50  ;;  %v1597_v7 = vmul.f32 %v3002_v59, %v1476_v19  ;;  %v2370_v8 = vadd.f32 %v2369_v37, %v2368_v55  ;;  %v1479_v20 = vadd.f32 %v1478_v38, %v2961_v21 }
 0x167   : > { %1828 = vst.msk [vmem:[%s3030_s12 + $0xc] sm:$0xf] %vm1824_vm1, %v2154_v61  ;;  %v1638_v47 = vadd.f32 %v3008_v5, %v1599_v0  ;;  %v1600_v14 = vmul.f32 %v3002_v59, %v1487_v29  ;;  %v3048_v15 = vadd.f32 %v2367_v51, %v2975_v58 }
 0x168   : > { %1826 = vst.msk [vmem:[%s3030_s12 + $0x4] sm:$0xf] %vm1824_vm1, %v2152_v63  ;;  %v1636_v39 = vadd.f32 %v3008_v5, %v1597_v7  ;;  %v1598_v2 = vmul.f32 %v3002_v59, %v1479_v20  ;;  %v3055_v17 = vadd.f32 %v2370_v8, %v2977_v9 }
 0x169   : > { %v1670_v6 = vmax.f32 %v1638_v47, 0.0  ;;  %v1639_v21 = vadd.f32 %v3008_v5, %v1600_v14 }
 0x16a   : > { %v1668_v25 = vmax.f32 %v1636_v39, 0.0  ;;  %v1637_v48 = vadd.f32 %v3008_v5, %v1598_v2  ;;  %v2371_v26 = vpop.f32.mrb[56].mxu1  ;;  %v2445_v27 = vpop.f32.mrb[56].mxu0 }
 0x16b   : > { %v2157_v58 = vpack.c.bf16 %v1670_v6, %v1670_v6  ;;  %v1671_v31 = vmax.f32 %v1639_v21, 0.0  ;;  %v1500_v1 = vadd.f32 %v2445_v27, %v2979_v13  ;;  %v2372_v49 = vpop.f32.mrb[57].mxu1  ;;  %v1491_v45 = vpop.f32.mrb[57].mxu0 }
 0x16c   : > { %v2155_v36 = vpack.c.bf16 %v1668_v25, %v1668_v25  ;;  %v1669_v18 = vmax.f32 %v1637_v48, 0.0  ;;  %v2373_v9 = vadd.f32 %v2372_v49, %v2371_v26  ;;  %v1492_v40 = vadd.f32 %v1491_v45, %v2971_v54  ;;  %v2374_v23 = vpop.f32.mrb[58].mxu1  ;;  %v2446_v53 = vpop.f32.mrb[58].mxu0 }
 0x16d   : > { %1831 = vst.msk [vmem:[%s3030_s12 + $0x18] sm:$0xf] %vm1824_vm1, %v2157_v58  ;;  %v2158_v41 = vpack.c.bf16 %v1671_v31, %v1671_v31  ;;  %v1603_v44 = vmul.f32 %v3002_v59, %v1500_v1  ;;  %v1503_v46 = vadd.f32 %v2446_v53, %v2981_v42  ;;  %v2375_v50 = vpop.f32.mrb[59].mxu1  ;;  %v1494_v13 = vpop.f32.mrb[59].mxu0 }
 0x16e   : > { %1829 = vst.msk [vmem:[%s3030_s12 + $0x10] sm:$0xf] %vm1824_vm1, %v2155_v36  ;;  %v2156_v51 = vpack.c.bf16 %v1669_v18, %v1669_v18  ;;  %v1601_v19 = vmul.f32 %v3002_v59, %v1492_v40  ;;  %v2376_v55 = vadd.f32 %v2375_v50, %v2374_v23  ;;  %v1495_v54 = vadd.f32 %v1494_v13, %v2973_v30 }
 0x16f   : > { %1832 = vst.msk [vmem:[%s3030_s12 + $0x1c] sm:$0xf] %vm1824_vm1, %v2158_v41  ;;  %v1642_v60 = vadd.f32 %v3008_v5, %v1603_v44  ;;  %v1604_v61 = vmul.f32 %v3002_v59, %v1503_v46  ;;  %v3074_v0 = vadd.f32 %v2373_v9, %v2983_v11 }
 0x170   : > { %1830 = vst.msk [vmem:[%s3030_s12 + $0x14] sm:$0xf] %vm1824_vm1, %v2156_v51  ;;  %v1640_v42 = vadd.f32 %v3008_v5, %v1601_v19  ;;  %v1602_v29 = vmul.f32 %v3002_v59, %v1495_v54  ;;  %v3081_v37 = vadd.f32 %v2376_v55, %v2985_v32 }
 0x171   : > { %v1674_v38 = vmax.f32 %v1642_v60, 0.0  ;;  %v1643_v30 = vadd.f32 %v3008_v5, %v1604_v61 }
 0x172   : > { %v1672_v63 = vmax.f32 %v1640_v42, 0.0  ;;  %v1641_v7 = vadd.f32 %v3008_v5, %v1602_v29  ;;  %v2377_v8 = vpop.f32.mrb[60].mxu1  ;;  %v2449_v20 = vpop.f32.mrb[60].mxu0 }
 0x173   : > { %v2161_v11 = vpack.c.bf16 %v1674_v38, %v1674_v38  ;;  %v1675_v47 = vmax.f32 %v1643_v30, 0.0  ;;  %v1516_v14 = vadd.f32 %v2449_v20, %v2995_v35  ;;  %v2378_v39 = vpop.f32.mrb[61].mxu1  ;;  %v1507_v2 = vpop.f32.mrb[61].mxu0 }
 0x174   : > { %v2159_v6 = vpack.c.bf16 %v1672_v63, %v1672_v63  ;;  %v1673_v21 = vmax.f32 %v1641_v7, 0.0  ;;  %v2379_v32 = vadd.f32 %v2378_v39, %v2377_v8  ;;  %v1508_v25 = vadd.f32 %v1507_v2, %v2987_v33  ;;  %v2380_v48 = vpop.f32.mrb[62].mxu1  ;;  %v2450_v26 = vpop.f32.mrb[62].mxu0 }
 0x175   : > { %1835 = vst.msk [vmem:[%s3030_s12 + $0x28] sm:$0xf] %vm1824_vm1, %v2161_v11  ;;  %v2162_v27 = vpack.c.bf16 %v1675_v47, %v1675_v47  ;;  %v1607_v58 = vmul.f32 %v3002_v59, %v1516_v14  ;;  %v1519_v31 = vadd.f32 %v2450_v26, %v2997_v12  ;;  %v2381_v1 = vpop.f32.mrb[63].mxu1  ;;  %v1510_v35 = vpop.f32.mrb[63].mxu0 }
 0x176   : > { %1833 = vst.msk [vmem:[%s3030_s12 + $0x20] sm:$0xf] %vm1824_vm1, %v2159_v6  ;;  %v2160_v49 = vpack.c.bf16 %v1673_v21, %v1673_v21  ;;  %v1605_v45 = vmul.f32 %v3002_v59, %v1508_v25  ;;  %v2382_v36 = vadd.f32 %v2381_v1, %v2380_v48  ;;  %v1511_v33 = vadd.f32 %v1510_v35, %v2989_v57 }
 0x177   : > { %1836 = vst.msk [vmem:[%s3030_s12 + $0x2c] sm:$0xf] %vm1824_vm1, %v2162_v27  ;;  %v1646_v18 = vadd.f32 %v3008_v5, %v1607_v58  ;;  %v1608_v9 = vmul.f32 %v3002_v59, %v1519_v31  ;;  %v1387_v40 = vadd.f32 %v2379_v32, %v2991_v43 }
 0x178   : > { %1834 = vst.msk [vmem:[%s3030_s12 + $0x24] sm:$0xf] %vm1824_vm1, %v2160_v49  ;;  %v1644_v12 = vadd.f32 %v3008_v5, %v1605_v45  ;;  %v1606_v23 = vmul.f32 %v3002_v59, %v1511_v33  ;;  %v1390_v53 = vadd.f32 %v2382_v36, %v2993_v52 }
 0x179   : > { %v1678_v41 = vmax.f32 %v1646_v18, 0.0  ;;  %v1647_v44 = vadd.f32 %v3008_v5, %v1608_v9 }
 0x17a   : > { %v1676_v57 = vmax.f32 %v1644_v12, 0.0  ;;  %v1645_v46 = vadd.f32 %v3008_v5, %v1606_v23  ;;  %v2383_v50 = vpop.f32.mrb[64].mxu1  ;;  %v2453_v13 = vpop.f32.mrb[64].mxu0 }
 0x17b   : > { %v2165_v51 = vpack.c.bf16 %v1678_v41, %v1678_v41  ;;  %v1679_v19 = vmax.f32 %v1647_v44, 0.0  ;;  %v1532_v43 = vadd.f32 %v2453_v13, %v3048_v15  ;;  %v2384_v55 = vpop.f32.mrb[65].mxu1  ;;  %v1523_v54 = vpop.f32.mrb[65].mxu0 }
 0x17c   : > { %v2163_v60 = vpack.c.bf16 %v1676_v57, %v1676_v57  ;;  %v1677_v61 = vmax.f32 %v1645_v46, 0.0  ;;  %v2385_v52 = vadd.f32 %v2384_v55, %v2383_v50  ;;  %v1524_v42 = vadd.f32 %v1523_v54, %v3016_v24  ;;  %v2386_v29 = vpop.f32.mrb[66].mxu1  ;;  %v2454_v38 = vpop.f32.mrb[66].mxu0 }
 0x17d   : > { %1839 = vst.msk [vmem:[%s3030_s12 + $0x38] sm:$0xf] %vm1824_vm1, %v2165_v51  ;;  %v2166_v30 = vpack.c.bf16 %v1679_v19, %v1679_v19  ;;  %v1611_v63 = vmul.f32 %v3002_v59, %v1532_v43  ;;  %v1535_v7 = vadd.f32 %v2454_v38, %v3055_v17  ;;  %v2387_v8 = vpop.f32.mrb[67].mxu1  ;;  %v1526_v15 = vpop.f32.mrb[67].mxu0 }
 0x17e   : > { %1837 = vst.msk [vmem:[%s3030_s12 + $0x30] sm:$0xf] %vm1824_vm1, %v2163_v60  ;;  %v2164_v20 = vpack.c.bf16 %v1677_v61, %v1677_v61  ;;  %v1609_v11 = vmul.f32 %v3002_v59, %v1524_v42  ;;  %v2388_v47 = vadd.f32 %v2387_v8, %v2386_v29  ;;  %v1527_v24 = vadd.f32 %v1526_v15, %v3024_v3 }
 0x17f   : > { %1840 = vst.msk [vmem:[%s3030_s12 + $0x3c] sm:$0xf] %vm1824_vm1, %v2166_v30  ;;  %v1650_v14 = vadd.f32 %v3008_v5, %v1611_v63  ;;  %v1612_v39 = vmul.f32 %v3002_v59, %v1535_v7  ;;  %v1395_v2 = vadd.f32 %v2385_v52, %v2935_v56 }
 0x180   : > { %1838 = vst.msk [vmem:[%s3030_s12 + $0x34] sm:$0xf] %vm1824_vm1, %v2164_v20  ;;  %v1648_v17 = vadd.f32 %v3008_v5, %v1609_v11  ;;  %v1610_v6 = vmul.f32 %v3002_v59, %v1527_v24  ;;  %v3127_v21 = vadd.f32 %v2388_v47, %v2937_v62 }
 0x181   : > { %v1682_v32 = vmax.f32 %v1650_v14, 0.0  ;;  %v1651_v3 = vadd.f32 %v3008_v5, %v1612_v39 }
 0x182   : > { %v1680_v25 = vmax.f32 %v1648_v17, 0.0  ;;  %v1649_v48 = vadd.f32 %v3008_v5, %v1610_v6  ;;  %v2389_v26 = vpop.f32.mrb[68].mxu1  ;;  %v2457_v27 = vpop.f32.mrb[68].mxu0 }
 0x183   : > { %v2169_v58 = vpack.c.bf16 %v1682_v32, %v1682_v32  ;;  %v1683_v56 = vmax.f32 %v1651_v3, 0.0  ;;  %v1548_v31 = vadd.f32 %v2457_v27, %v1387_v40  ;;  %v2390_v1 = vpop.f32.mrb[69].mxu1  ;;  %v1539_v35 = vpop.f32.mrb[69].mxu0 }
 0x184   : > { %v2167_v49 = vpack.c.bf16 %v1680_v25, %v1680_v25  ;;  %v1681_v45 = vmax.f32 %v1649_v48, 0.0  ;;  %v2391_v62 = vadd.f32 %v2390_v1, %v2389_v26  ;;  %v1540_v36 = vadd.f32 %v1539_v35, %v3074_v0  ;;  %v2392_v33 = vpop.f32.mrb[70].mxu1  ;;  %v2458_v18 = vpop.f32.mrb[70].mxu0 }
 0x185   : > { %1843 = vst.msk [vmem:[%s3030_s12 + $0x48] sm:$0xf] %vm1824_vm1, %v2169_v58  ;;  %v2170_v9 = vpack.c.bf16 %v1683_v56, %v1683_v56  ;;  %v1615_v12 = vmul.f32 %v3002_v59, %v1548_v31  ;;  %v1551_v23 = vadd.f32 %v2458_v18, %v1390_v53  ;;  %v2393_v41 = vpop.f32.mrb[71].mxu1  ;;  %v1542_v44 = vpop.f32.mrb[71].mxu0 }
 0x186   : > { %1841 = vst.msk [vmem:[%s3030_s12 + $0x40] sm:$0xf] %vm1824_vm1, %v2167_v49  ;;  %v2168_v40 = vpack.c.bf16 %v1681_v45, %v1681_v45  ;;  %v1613_v57 = vmul.f32 %v3002_v59, %v1540_v36  ;;  %v2394_v46 = vadd.f32 %v2393_v41, %v2392_v33  ;;  %v1543_v50 = vadd.f32 %v1542_v44, %v3081_v37 }
 0x187   : > { %1844 = vst.msk [vmem:[%s3030_s12 + $0x4c] sm:$0xf] %vm1824_vm1, %v2170_v9  ;;  %v1654_v0 = vadd.f32 %v3008_v5, %v1615_v12  ;;  %v1616_v13 = vmul.f32 %v3002_v59, %v1551_v23  ;;  %v1403_v51 = vadd.f32 %v2391_v62, %v2939_v4 }
 0x188   : > { %1842 = vst.msk [vmem:[%s3030_s12 + $0x44] sm:$0xf] %vm1824_vm1, %v2168_v40  ;;  %v1652_v53 = vadd.f32 %v3008_v5, %v1613_v57  ;;  %v1614_v19 = vmul.f32 %v3002_v59, %v1543_v50  ;;  %v1406_v43 = vadd.f32 %v2394_v46, %v2941_v10 }
 0x189   : > { %v1686_v55 = vmax.f32 %v1654_v0, 0.0  ;;  %v1655_v54 = vadd.f32 %v3008_v5, %v1616_v13 }
 0x18a   : > { %v1684_v37 = vmax.f32 %v1652_v53, 0.0  ;;  %v1653_v60 = vadd.f32 %v3008_v5, %v1614_v19  ;;  %v2395_v61 = vpop.f32.mrb[72].mxu1  ;;  %v2461_v52 = vpop.f32.mrb[72].mxu0 }
 0x18b   : > { %v2173_v42 = vpack.c.bf16 %v1686_v55, %v1686_v55  ;;  %v1687_v29 = vmax.f32 %v1655_v54, 0.0  ;;  %v1564_v4 = vadd.f32 %v2461_v52, %v1403_v51  ;;  %v2396_v38 = vpop.f32.mrb[73].mxu1  ;;  %v1555_v30 = vpop.f32.mrb[73].mxu0 }
 0x18c   : > { %v2171_v63 = vpack.c.bf16 %v1684_v37, %v1684_v37  ;;  %v1685_v7 = vmax.f32 %v1653_v60, 0.0  ;;  %v2397_v8 = vadd.f32 %v2396_v38, %v2395_v61  ;;  %v1556_v10 = vadd.f32 %v1555_v30, %v1395_v2  ;;  %v2398_v15 = vpop.f32.mrb[74].mxu1  ;;  %v2462_v20 = vpop.f32.mrb[74].mxu0 }
 0x18d   : > { %1847 = vst.msk [vmem:[%s3030_s12 + $0x58] sm:$0xf] %vm1824_vm1, %v2173_v42  ;;  %v2174_v11 = vpack.c.bf16 %v1687_v29, %v1687_v29  ;;  %v1619_v47 = vmul.f32 %v3002_v59, %v1564_v4  ;;  %v1567_v24 = vadd.f32 %v2462_v20, %v1406_v43  ;;  %v2399_v14 = vpop.f32.mrb[75].mxu1  ;;  %v1558_v39 = vpop.f32.mrb[75].mxu0 }
 0x18e   : > { %1845 = vst.msk [vmem:[%s3030_s12 + $0x50] sm:$0xf] %vm1824_vm1, %v2171_v63  ;;  %v2172_v17 = vpack.c.bf16 %v1685_v7, %v1685_v7  ;;  %v1617_v6 = vmul.f32 %v3002_v59, %v1556_v10  ;;  %v2400_v32 = vadd.f32 %v2399_v14, %v2398_v15  ;;  %v1559_v3 = vadd.f32 %v1558_v39, %v3127_v21 }
 0x18f   : > { %1848 = vst.msk [vmem:[%s3030_s12 + $0x5c] sm:$0xf] %vm1824_vm1, %v2174_v11  ;;  %v1658_v2 = vadd.f32 %v3008_v5, %v1619_v47  ;;  %v1620_v25 = vmul.f32 %v3002_v59, %v1567_v24  ;;  %v1411_v48 = vadd.f32 %v2397_v8, %v2943_v16 }
 0x190   : > { %1846 = vst.msk [vmem:[%s3030_s12 + $0x54] sm:$0xf] %vm1824_vm1, %v2172_v17  ;;  %v1656_v26 = vadd.f32 %v3008_v5, %v1617_v6  ;;  %v1618_v27 = vmul.f32 %v3002_v59, %v1559_v3  ;;  %v1414_v58 = vadd.f32 %v2400_v32, %v2945_v22 }
 0x191   : > { %v1690_v56 = vmax.f32 %v1658_v2, 0.0  ;;  %v1659_v21 = vadd.f32 %v3008_v5, %v1620_v25 }
 0x192   : > { %v1688_v31 = vmax.f32 %v1656_v26, 0.0  ;;  %v1657_v1 = vadd.f32 %v3008_v5, %v1618_v27  ;;  %v2401_v35 = vpop.f32.mrb[76].mxu1  ;;  %v2465_v49 = vpop.f32.mrb[76].mxu0 }
 0x193   : > { %v2177_v45 = vpack.c.bf16 %v1690_v56, %v1690_v56  ;;  %v1691_v16 = vmax.f32 %v1659_v21, 0.0  ;;  %v2402_v62 = vpop.f32.mrb[77].mxu1  ;;  %v1571_v36 = vpop.f32.mrb[77].mxu0 }
 0x194   : > { %v2175_v33 = vpack.c.bf16 %v1688_v31, %v1688_v31  ;;  %v1689_v18 = vmax.f32 %v1657_v1, 0.0  ;;  %v2403_v9 = vadd.f32 %v2402_v62, %v2401_v35  ;;  %v1572_v22 = vadd.f32 %v1571_v36, %v1411_v48  ;;  %v2404_v12 = vpop.f32.mrb[78].mxu1  ;;  %v2466_v23 = vpop.f32.mrb[78].mxu0 }
 0x195   : > { %1851 = vst.msk [vmem:[%s3030_s12 + $0x68] sm:$0xf] %vm1824_vm1, %v2177_v45  ;;  %v2178_v41 = vpack.c.bf16 %v1691_v16, %v1691_v16  ;;  %v2405_v44 = vpop.f32.mrb[79].mxu1  ;;  %v1574_v40 = vpop.f32.mrb[79].mxu0 }
 0x196   : > { %1849 = vst.msk [vmem:[%s3030_s12 + $0x60] sm:$0xf] %vm1824_vm1, %v2175_v33  ;;  %v2176_v57 = vpack.c.bf16 %v1689_v18, %v1689_v18  ;;  %v1419_v46 = vadd.f32 %v2403_v9, %v2947_v28  ;;  %v1621_v50 = vmul.f32 %v3002_v59, %v1572_v22  ;;  %v2406_v0 = vadd.f32 %v2405_v44, %v2404_v12 }
 0x197   : > { %1852 = vst.msk [vmem:[%s3030_s12 + $0x6c] sm:$0xf] %vm1824_vm1, %v2178_v41  ;;  %v1575_v13 = vadd.f32 %v1574_v40, %v1414_v58 }
 0x198   : > { %1850 = vst.msk [vmem:[%s3030_s12 + $0x64] sm:$0xf] %vm1824_vm1, %v2176_v57  ;;  %v1580_v51 = vadd.f32 %v2465_v49, %v1419_v46  ;;  %v1660_v53 = vadd.f32 %v3008_v5, %v1621_v50  ;;  %v1422_v19 = vadd.f32 %v2406_v0, %v2949_v34 }
 0x199   : > { %v1622_v43 = vmul.f32 %v3002_v59, %v1575_v13 }
 0x19a   : > { %v1623_v28 = vmul.f32 %v3002_v59, %v1580_v51  ;;  %v1692_v55 = vmax.f32 %v1660_v53, 0.0  ;;  %v1583_v54 = vadd.f32 %v2466_v23, %v1422_v19 }
 0x19b   : > { %v1661_v37 = vadd.f32 %v3008_v5, %v1622_v43 }
 0x19c   : > { %v1662_v60 = vadd.f32 %v3008_v5, %v1623_v28  ;;  %v2179_v61 = vpack.c.bf16 %v1692_v55, %v1692_v55  ;;  %v1624_v52 = vmul.f32 %v3002_v59, %v1583_v54 }
 0x19d   : > { %v1693_v42 = vmax.f32 %v1661_v37, 0.0 }
 0x19e   : > { %v1694_v29 = vmax.f32 %v1662_v60, 0.0  ;;  %1853 = vst.msk [vmem:[%s3030_s12 + $0x70] sm:$0xf] %vm1824_vm1, %v2179_v61  ;;  %v1663_v34 = vadd.f32 %v3008_v5, %v1624_v52 }
 0x19f   : > { %v2180_v4 = vpack.c.bf16 %v1693_v42, %v1693_v42 }
 0x1a0   : > { %v2181_v38 = vpack.c.bf16 %v1694_v29, %v1694_v29  ;;  %v1695_v30 = vmax.f32 %v1663_v34, 0.0 }
 0x1a1   : > { %1854 = vst.msk [vmem:[%s3030_s12 + $0x74] sm:$0xf] %vm1824_vm1, %v2180_v4 }
 0x1a2   : > { %1855 = vst.msk [vmem:[%s3030_s12 + $0x78] sm:$0xf] %vm1824_vm1, %v2181_v38  ;;  %v2182_v63 = vpack.c.bf16 %v1695_v30, %v1695_v30 }
 0x1a4   : > { %1856 = vst.msk [vmem:[%s3030_s12 + $0x7c] sm:$0xf] %vm1824_vm1, %v2182_v63 }
 0x1a5 PF: > { %s14_s17 = sadd.s32 1, %s2678_s17   ;;  %s3210_s15 = smov %s2674_s16 }
 0x1a6   : > { %p11_p5 = scmp.ge.s32.totalorder %s14_s17, 4   ;;  %s3211_s16 = smov %s3213_s18 }
 0x1a8   :  { %13 = sbr.rel (!%p11_p5) target bundleno = 2 (0x2), region = 75 }

// kernel: decoder_bldbd_forward.3
= control target key start
LH: loop header
LB: loop body
LE: loop exit
PB: predicated region body
PF: predicated region fallthrough
CT: control target
= control target key end

     0   :  { %s2512_s15 = smov 0   ;;  %s2514_s16 = smov 0   ;;  %s2977_s0 = inlined_call_operand.vmem [shape: bf16[512,576], index: 0, kind: input, shape index: {}]   ;;  %s2978_s1 = inlined_call_operand.vmem [shape: bf16[576,128], index: 1, kind: input, shape index: {}]   ;;  %s2979_s2 = inlined_call_operand.vmem [shape: f32[1,128], index: 2, kind: input, shape index: {}]   ;;  %s2980_s3 = inlined_call_operand.vmem [shape: f32[1,128], index: 3, kind: input, shape index: {}]   ;;  %s2981_s4 = inlined_call_operand.vmem [shape: f32[512,128], index: 4, kind: output, shape index: {}]  }
   0x1   :  { %s2516_s17 = smov 0  }
   0x2 LB: > { %s26_s18 = sadd.s32 1, %s2481_s16  ;;  %p1849_p0 = scmp.ge.s32.totalorder %s2485_s17, 1  ;;  %s2485_s17 = sphi %s2516_s17, %s14_s17   ;;  %s2481_s16 = sphi %s2514_s16, %s2983_s16   ;;  %s2477_s15 = sphi %s2512_s15, %s2982_s15  }
   0x3   : > { %p28_p1 = scmp.ge.s32.totalorder %s26_s18, 2  ;;  %p203_p2 = scmp.lt.s32.totalorder %s2485_s17, 3 }
   0x5   : > { %s2985_s18 = smov (%p28_p1, %s26_s18), 0  ;;  %p204_p3 = pnand %p1849_p0, %p203_p2 }
   0x6   : > { %v2315_v0 = vld [vmem:[%s2978_s1 + $0x40] sm:$0xff] (!%p204_p3)   ;;  %s1850_s21 = sshll.u32 (!%p204_p3), %s2477_s15, 5  ;;  %v2317_v2 = vld [vmem:[%s2978_s1 + $0x48] sm:$0xff] (!%p204_p3)   ;;  %v2319_v4 = vld [vmem:[%s2978_s1 + $0x50] sm:$0xff] (!%p204_p3)   ;;  %vm1054_vm0 = vcmask (!%p204_p3), 523264  }
   0x7   : > { %207 = sbr.rel (%p204_p3) target bundleno = 419 (0x1a3), region = 36  ;;  %v2316_v1 = vld [vmem:[%s2978_s1] sm:$0xff] (!%p204_p3)   ;;  %1990 = vmatprep.subr.bf16.mxu0 (!%p204_p3), %v2315_v0  ;;  %2274 = vmatprep.subr.bf16.mxu1 (!%p204_p3), %v2315_v0  ;;  %p244_p4 = scmp.lt.s32.totalorder (!%p204_p3), %s1850_s21, 63  ;;  %v2318_v3 = vld [vmem:[%s2978_s1 + $0x8] sm:$0xff] (!%p204_p3)   ;;  %v2320_v5 = vld [vmem:[%s2978_s1 + $0x10] sm:$0xff] (!%p204_p3)  }
   0x8   : > { %1991 = vmatpush3.bf16.msra.mxu0 (!%p204_p3), %v2316_v1  ;;  %2282 = vmatpush3.bf16.msra.mxu1 (!%p204_p3), %v2316_v1  ;;  %v2321_v6 = vld [vmem:[%s2978_s1 + $0x58] sm:$0xff] (!%p204_p3)   ;;  %v2323_v8 = vld [vmem:[%s2978_s1 + $0x60] sm:$0xff] (!%p204_p3)   ;;  %v2325_v10 = vld [vmem:[%s2978_s1 + $0x68] sm:$0xff] (!%p204_p3)  }
   0x9   : > { %1992 = vmatprep.subr.bf16.mxu0 (!%p204_p3), %v2317_v2  ;;  %2275 = vmatprep.subr.bf16.mxu1 (!%p204_p3), %v2317_v2  ;;  %v2322_v7 = vld [vmem:[%s2978_s1 + $0x18] sm:$0xff] (!%p204_p3)   ;;  %v2324_v9 = vld [vmem:[%s2978_s1 + $0x20] sm:$0xff] (!%p204_p3)   ;;  %v2326_v13 = vld [vmem:[%s2978_s1 + $0x28] sm:$0xff] (!%p204_p3)  }
   0xa   : > { %v2327_v14 = vld [vmem:[%s2978_s1 + $0x70] sm:$0xff] (!%p204_p3)   ;;  %v2329_v16 = vld [vmem:[%s2978_s1 + $0x78] sm:$0xff] (!%p204_p3)   ;;  %v2337_v18 = vld [vmem:[%s2978_s1 + $0xc0] sm:$0xff] (!%p204_p3)  }
   0xb   : > { %v2328_v15 = vld [vmem:[%s2978_s1 + $0x30] sm:$0xff] (!%p204_p3)   ;;  %v2330_v17 = vld [vmem:[%s2978_s1 + $0x38] sm:$0xff] (!%p204_p3)   ;;  %v2340_v19 = vld [vmem:[%s2978_s1 + $0x100] sm:$0xff] (!%p204_p3)  }
   0xc   : > { %1993 = vmatpush3.bf16.msra.mxu0 (!%p204_p3), %v2318_v3  ;;  %2283 = vmatpush3.bf16.msra.mxu1 (!%p204_p3), %v2318_v3  ;;  %v2338_v22 = vld [vmem:[%s2978_s1 + $0x80] sm:$0xff] (!%p204_p3)   ;;  %v2339_v23 = vld [vmem:[%s2978_s1 + $0xc8] sm:$0xff] (!%p204_p3)   ;;  %v2348_v28 = vld [vmem:[%s2978_s1 + $0xd0] sm:$0xff] (!%p204_p3)  }
   0xd   : > { %1994 = vmatprep.subr.bf16.mxu0 (!%p204_p3), %v2319_v4  ;;  %2276 = vmatprep.subr.bf16.mxu1 (!%p204_p3), %v2319_v4  ;;  %v2341_v26 = vld [vmem:[%s2978_s1 + $0x88] sm:$0xff] (!%p204_p3)   ;;  %v2349_v30 = vld [vmem:[%s2978_s1 + $0x90] sm:$0xff] (!%p204_p3)   ;;  %v2350_v31 = vld [vmem:[%s2978_s1 + $0xd8] sm:$0xff] (!%p204_p3)  }
   0xe   : > { %s2987_s21 = smov (!%p244_p4, %s1850_s21), 63  ;;  %v2351_v34 = vld [vmem:[%s2978_s1 + $0x98] sm:$0xff]   ;;  %v2371_v35 = vld [vmem:[%s2978_s1 + $0x108] sm:$0xff]   ;;  %v2358_v37 = vld [vmem:[%s2978_s1 + $0xe0] sm:$0xff]  }
   0xf   : > { %s2290_s8 = smul.u32 20, %s2987_s21  ;;  %v2359_v39 = vld [vmem:[%s2978_s1 + $0xa0] sm:$0xff]   ;;  %v2360_v40 = vld [vmem:[%s2978_s1 + $0xe8] sm:$0xff]   ;;  %v2368_v46 = vld [vmem:[%s2978_s1 + $0xf0] sm:$0xff]   ;;  %s1853_s9 = sshll.u32 %s2987_s21, 3 }
  0x10   : > { %1995 = vmatpush3.bf16.msra.mxu0 %v2320_v5  ;;  %2284 = vmatpush3.bf16.msra.mxu1 %v2320_v5  ;;  %v2361_v43 = vld [vmem:[%s2978_s1 + $0xa8] sm:$0xff]   ;;  %v2391_v47 = vld [vmem:[%s2978_s1 + $0x110] sm:$0xff]   ;;  %v2370_v49 = vld [vmem:[%s2978_s1 + $0xf8] sm:$0xff]   ;;  %s2831_s11 = scalar_lea.vmem %s2981_s4, %s1853_s9 }
  0x11   : > { %1996 = vmatprep.subr.bf16.mxu0 %v2321_v6  ;;  %2277 = vmatprep.subr.bf16.mxu1 %v2321_v6  ;;  %s2563_s15 = scalar_lea.vmem %s2977_s0, %s2290_s8  ;;  %v2369_v48 = vld [vmem:[%s2978_s1 + $0xb0] sm:$0xff]   ;;  %v2372_v52 = vld [vmem:[%s2978_s1 + $0xb8] sm:$0xff]  }
  0x12   : > { %v2333_v11 = vld [vmem:[%s2563_s15 + $0x4] ss:$20 sps:$4 sm:$0xff]   ;;  %v2331_v20 = vld [vmem:[%s2563_s15] ss:$20 sps:$4 sm:$0xff]   ;;  %v2346_v27 = vld [vmem:[%s2563_s15 + $0x28] ss:$20 sps:$4 sm:$0xff]  }
  0x13   : > { %v2336_v12 = vld [vmem:[%s2563_s15 + $0x1e4] ss:$20 sps:$4 sm:$0xff]   ;;  %1135 = vmatprep.mubr.bf16.mxu0 %v2333_v11  ;;  %v2334_v21 = vld [vmem:[%s2563_s15 + $0x1e0] ss:$20 sps:$4 sm:$0xff]   ;;  %v2347_v29 = vld [vmem:[%s2563_s15 + $0x208] ss:$20 sps:$4 sm:$0xff]  }
  0x14   : > { %1997 = vmatpush3.bf16.msra.mxu0 %v2322_v7  ;;  %2285 = vmatpush3.bf16.msra.mxu1 %v2322_v7  ;;  %v2342_v24 = vld [vmem:[%s2563_s15 + $0x2c] ss:$20 sps:$4 sm:$0xff]   ;;  %v2352_v32 = vld [vmem:[%s2563_s15 + $0x54] ss:$20 sps:$4 sm:$0xff]   ;;  %v2356_v36 = vld [vmem:[%s2563_s15 + $0x50] ss:$20 sps:$4 sm:$0xff]  }
  0x15   : > { %1998 = vmatprep.subr.bf16.mxu0 %v2323_v8  ;;  %2278 = vmatprep.subr.bf16.mxu1 %v2323_v8  ;;  %v2344_v25 = vld [vmem:[%s2563_s15 + $0x20c] ss:$20 sps:$4 sm:$0xff]   ;;  %v2354_v33 = vld [vmem:[%s2563_s15 + $0x234] ss:$20 sps:$4 sm:$0xff]   ;;  %v2357_v38 = vld [vmem:[%s2563_s15 + $0x230] ss:$20 sps:$4 sm:$0xff]  }
  0x16   : > { %1231 = vmatprep.mubr.bf16.mxu1 %v2336_v12  ;;  %v2362_v41 = vld [vmem:[%s2563_s15 + $0x7c] ss:$20 sps:$4 sm:$0xff]   ;;  %v2366_v44 = vld [vmem:[%s2563_s15 + $0x78] ss:$20 sps:$4 sm:$0xff]   ;;  %v2378_v54 = vld [vmem:[%s2563_s15 + $0xa0] ss:$20 sps:$4 sm:$0xff]  }
  0x17   : > { %v2364_v42 = vld [vmem:[%s2563_s15 + $0x25c] ss:$20 sps:$4 sm:$0xff]   ;;  %v2367_v45 = vld [vmem:[%s2563_s15 + $0x258] ss:$20 sps:$4 sm:$0xff]   ;;  %v2381_v57 = vld [vmem:[%s2563_s15 + $0x34] ss:$20 sps:$4 sm:$0xff]  }
  0x18   : > { %1999 = vmatpush3.bf16.msra.mxu0 %v2324_v9  ;;  %2286 = vmatpush3.bf16.msra.mxu1 %v2324_v9  ;;  %v2373_v50 = vld [vmem:[%s2563_s15 + $0xa4] ss:$20 sps:$4 sm:$0xff]   ;;  %v2377_v51 = vld [vmem:[%s2563_s15 + $0xc] ss:$20 sps:$4 sm:$0xff]   ;;  %v2375_v53 = vld [vmem:[%s2563_s15 + $0x8] ss:$20 sps:$4 sm:$0xff]  }
  0x19   : > { %2000 = vmatprep.subr.bf16.mxu0 %v2325_v10  ;;  %2279 = vmatprep.subr.bf16.mxu1 %v2325_v10  ;;  %v2379_v55 = vld [vmem:[%s2563_s15 + $0xcc] ss:$20 sps:$4 sm:$0xff]   ;;  %v2410_v56 = vld [vmem:[%s2978_s1 + $0x118] sm:$0xff]   ;;  %v2384_v59 = vld [vmem:[%s2563_s15 + $0x30] ss:$20 sps:$4 sm:$0xff]  }
  0x1a   : > { %v2383_v58 = vld [vmem:[%s2563_s15 + $0xc8] ss:$20 sps:$4 sm:$0xff]   ;;  %v2389_v62 = vld [vmem:[%s2563_s15 + $0xf0] ss:$20 sps:$4 sm:$0xff]   ;;  %v2390_v63 = vld [vmem:[%s2563_s15 + $0x58] ss:$20 sps:$4 sm:$0xff]  }
  0x1b   : > { %v2385_v60 = vld [vmem:[%s2563_s15 + $0xf4] ss:$20 sps:$4 sm:$0xff]   ;;  %v2387_v61 = vld [vmem:[%s2563_s15 + $0x5c] ss:$20 sps:$4 sm:$0xff]   ;;  %v2394_v1 = vld [vmem:[%s2563_s15 + $0x84] ss:$20 sps:$4 sm:$0xff]  }
  0x1c   : > { %2001 = vmatpush3.bf16.msra.mxu0 %v2326_v13  ;;  %2287 = vmatpush3.bf16.msra.mxu1 %v2326_v13  ;;  %v2392_v0 = vld [vmem:[%s2563_s15 + $0x11c] ss:$20 sps:$4 sm:$0xff]   ;;  %v2396_v2 = vld [vmem:[%s2563_s15 + $0x118] ss:$20 sps:$4 sm:$0xff]   ;;  %v2397_v3 = vld [vmem:[%s2563_s15 + $0x80] ss:$20 sps:$4 sm:$0xff]  }
  0x1d   : > { %2002 = vmatprep.subr.bf16.mxu0 %v2327_v14  ;;  %2280 = vmatprep.subr.bf16.mxu1 %v2327_v14  ;;  %v2398_v4 = vld [vmem:[%s2563_s15 + $0x144] ss:$20 sps:$4 sm:$0xff]   ;;  %v2400_v5 = vld [vmem:[%s2563_s15 + $0xac] ss:$20 sps:$4 sm:$0xff]   ;;  %v2403_v7 = vld [vmem:[%s2563_s15 + $0xa8] ss:$20 sps:$4 sm:$0xff]  }
  0x1e   : > { %v2402_v6 = vld [vmem:[%s2563_s15 + $0x140] ss:$20 sps:$4 sm:$0xff]   ;;  %v2408_v10 = vld [vmem:[%s2563_s15 + $0x168] ss:$20 sps:$4 sm:$0xff]   ;;  %v2409_v11 = vld [vmem:[%s2563_s15 + $0xd0] ss:$20 sps:$4 sm:$0xff]  }
  0x1f   : > { %v2404_v8 = vld [vmem:[%s2563_s15 + $0x16c] ss:$20 sps:$4 sm:$0xff]   ;;  %v2406_v9 = vld [vmem:[%s2563_s15 + $0xd4] ss:$20 sps:$4 sm:$0xff]   ;;  %v2413_v13 = vld [vmem:[%s2563_s15 + $0xfc] ss:$20 sps:$4 sm:$0xff]  }
  0x20   : > { %2003 = vmatpush3.bf16.msra.mxu0 %v2328_v15  ;;  %2288 = vmatpush3.bf16.msra.mxu1 %v2328_v15  ;;  %v2411_v12 = vld [vmem:[%s2563_s15 + $0x194] ss:$20 sps:$4 sm:$0xff]   ;;  %v2415_v14 = vld [vmem:[%s2563_s15 + $0x190] ss:$20 sps:$4 sm:$0xff]   ;;  %v2416_v15 = vld [vmem:[%s2563_s15 + $0xf8] ss:$20 sps:$4 sm:$0xff]  }
  0x21   : > { %2004 = vmatprep.subr.bf16.mxu0 %v2329_v16  ;;  %2281 = vmatprep.subr.bf16.mxu1 %v2329_v16  ;;  %v2417_v16 = vld [vmem:[%s2563_s15 + $0x1bc] ss:$20 sps:$4 sm:$0xff]  }
  0x24   : > { %2005 = vmatpush3.bf16.msra.mxu0 %v2330_v17  ;;  %2289 = vmatpush3.bf16.msra.mxu1 %v2330_v17  ;;  %v2419_v17 = vld [vmem:[%s2563_s15 + $0x124] ss:$20 sps:$4 sm:$0xff]  }
  0x25   : > { %2102 = vmatprep.subr.bf16.mxu1 %v2337_v18  ;;  %2234 = vmatprep.subr.bf16.mxu0 %v2340_v19  ;;  %v2421_v18 = vld [vmem:[%s2563_s15 + $0x1b8] ss:$20 sps:$4 sm:$0xff]  }
  0x27   : > { %1136 = vmatmul.mubr.bf16.vlgmr.msra.gmra.mrb[0].mxu0 %v2331_v20  ;;  %1232 = vmatmul.mubr.bf16.vlgmr.msra.gmra.mrb[0].mxu1 %v2334_v21  ;;  %v2423_v20 = vld [vmem:[%s2563_s15 + $0x14c] ss:$20 sps:$4 sm:$0xff]   ;;  %v2425_v21 = vld [vmem:[%s2563_s15 + $0x10] ss:$20 sps:$4 sm:$0xff]  }
  0x28   : > { %2103 = vmatpush3.bf16.msra.mxu1 %v2338_v22  ;;  %2235 = vmatpush3.bf16.msra.mxu0 %v2340_v19  ;;  %v2422_v19 = vld [vmem:[%s2563_s15 + $0x120] ss:$20 sps:$4 sm:$0xff]   ;;  %v2426_v22 = vld [vmem:[%s2563_s15 + $0x148] ss:$20 sps:$4 sm:$0xff]  }
  0x29   : > { %2104 = vmatprep.subr.bf16.mxu1 %v2339_v23  ;;  %1143 = vmatprep.mubr.bf16.mxu0 %v2342_v24  ;;  %v2427_v23 = vld [vmem:[%s2563_s15 + $0x38] ss:$20 sps:$4 sm:$0xff]   ;;  %v2428_v24 = vld [vmem:[%s2563_s15 + $0x174] ss:$20 sps:$4 sm:$0xff]  }
  0x2a   : > { %1239 = vmatprep.mubr.bf16.mxu1 %v2344_v25  ;;  %2236 = vmatprep.subr.bf16.mxu0 %v2371_v35  ;;  %v2430_v25 = vld [vmem:[%s2563_s15 + $0x60] ss:$20 sps:$4 sm:$0xff]  }
  0x2c   : > { %2105 = vmatpush3.bf16.msra.mxu1 %v2341_v26  ;;  %2237 = vmatpush3.bf16.msra.mxu0 %v2371_v35  ;;  %v2431_v26 = vld [vmem:[%s2563_s15 + $0x170] ss:$20 sps:$4 sm:$0xff]   ;;  %v2442_v35 = vld [vmem:[%s2563_s15 + $0x128] ss:$20 sps:$4 sm:$0xff]  }
  0x2d   : > { %2106 = vmatprep.subr.bf16.mxu1 %v2348_v28  ;;  %2238 = vmatprep.subr.bf16.mxu0 %v2391_v47  ;;  %v2433_v28 = vld [vmem:[%s2563_s15 + $0x19c] ss:$20 sps:$4 sm:$0xff]  }
  0x2f   : > { %1144 = vmatmul.mubr.bf16.gmra.mrb[4].mxu0 %v2346_v27  ;;  %1240 = vmatmul.mubr.bf16.gmra.mrb[4].mxu1 %v2347_v29  ;;  %v2432_v27 = vld [vmem:[%s2563_s15 + $0x88] ss:$20 sps:$4 sm:$0xff]   ;;  %v2435_v29 = vld [vmem:[%s2563_s15 + $0xb0] ss:$20 sps:$4 sm:$0xff]  }
  0x30   : > { %2107 = vmatpush3.bf16.msra.mxu1 %v2349_v30  ;;  %1151 = vmatprep.mubr.bf16.mxu0 %v2352_v32  ;;  %v2436_v30 = vld [vmem:[%s2563_s15 + $0x198] ss:$20 sps:$4 sm:$0xff]  }
  0x31   : > { %2108 = vmatprep.subr.bf16.mxu1 %v2350_v31  ;;  %1247 = vmatprep.mubr.bf16.mxu1 %v2354_v33  ;;  %v2437_v31 = vld [vmem:[%s2563_s15 + $0xd8] ss:$20 sps:$4 sm:$0xff]   ;;  %v2440_v33 = vld [vmem:[%s2563_s15 + $0x100] ss:$20 sps:$4 sm:$0xff]  }
  0x32   : > { %2239 = vmatpush3.bf16.msra.mxu0 %v2391_v47  ;;  %v2438_v32 = vld [vmem:[%s2563_s15 + $0x1c4] ss:$20 sps:$4 sm:$0xff]  }
  0x33   : > { %2240 = vmatprep.subr.bf16.mxu0 %v2410_v56  ;;  %v2457_v47 = vld [vmem:[%s2563_s15 + $0x218] ss:$20 sps:$4 sm:$0xff]  }
  0x34   : > { %2109 = vmatpush3.bf16.msra.mxu1 %v2351_v34  ;;  %v2441_v34 = vld [vmem:[%s2563_s15 + $0x1c0] ss:$20 sps:$4 sm:$0xff]  }
  0x35   : > { %2110 = vmatprep.subr.bf16.mxu1 %v2358_v37  ;;  %v2445_v37 = vld [vmem:[%s2563_s15 + $0x150] ss:$20 sps:$4 sm:$0xff]  }
  0x36   : > { %2241 = vmatpush3.bf16.msra.mxu0 %v2410_v56 }
  0x37   : > { %1152 = vmatmul.mubr.bf16.gmra.mrb[8].mxu0 %v2356_v36  ;;  %1248 = vmatmul.mubr.bf16.gmra.mrb[8].mxu1 %v2357_v38  ;;  %v2443_v36 = vld [vmem:[%s2563_s15 + $0x1ec] ss:$20 sps:$4 sm:$0xff]   ;;  %v2446_v38 = vld [vmem:[%s2563_s15 + $0x1e8] ss:$20 sps:$4 sm:$0xff]  }
  0x38   : > { %2111 = vmatpush3.bf16.msra.mxu1 %v2359_v39  ;;  %1159 = vmatprep.mubr.bf16.mxu0 %v2362_v41  ;;  %v2447_v39 = vld [vmem:[%s2563_s15 + $0x178] ss:$20 sps:$4 sm:$0xff]   ;;  %v2450_v41 = vld [vmem:[%s2563_s15 + $0x1a0] ss:$20 sps:$4 sm:$0xff]  }
  0x39   : > { %2112 = vmatprep.subr.bf16.mxu1 %v2360_v40  ;;  %1255 = vmatprep.mubr.bf16.mxu1 %v2364_v42  ;;  %v2448_v40 = vld [vmem:[%s2563_s15 + $0x214] ss:$20 sps:$4 sm:$0xff]   ;;  %v2451_v42 = vld [vmem:[%s2563_s15 + $0x210] ss:$20 sps:$4 sm:$0xff]  }
  0x3c   : > { %2113 = vmatpush3.bf16.msra.mxu1 %v2361_v43  ;;  %v2452_v43 = vld [vmem:[%s2563_s15 + $0x1c8] ss:$20 sps:$4 sm:$0xff]  }
  0x3d   : > { %2114 = vmatprep.subr.bf16.mxu1 %v2368_v46  ;;  %v2456_v46 = vld [vmem:[%s2563_s15 + $0x238] ss:$20 sps:$4 sm:$0xff]  }
  0x3f   : > { %1160 = vmatmul.mubr.bf16.gmra.mrb[12].mxu0 %v2366_v44  ;;  %1256 = vmatmul.mubr.bf16.gmra.mrb[12].mxu1 %v2367_v45  ;;  %v2453_v44 = vld [vmem:[%s2563_s15 + $0x23c] ss:$20 sps:$4 sm:$0xff]  }
  0x40   : > { %2115 = vmatpush3.bf16.msra.mxu1 %v2369_v48  ;;  %1167 = vmatprep.mubr.bf16.mxu0 %v2373_v50  ;;  %v2455_v45 = vld [vmem:[%s2563_s15 + $0x1f0] ss:$20 sps:$4 sm:$0xff]   ;;  %v2461_v50 = vld [vmem:[%s2563_s15 + $0x260] ss:$20 sps:$4 sm:$0xff]  }
  0x41   : > { %2116 = vmatprep.subr.bf16.mxu1 %v2370_v49  ;;  %1296 = vmatprep.mubr.bf16.mxu1 %v2377_v51  ;;  %v2458_v48 = vld [vmem:[%s2563_s15 + $0x264] ss:$20 sps:$4 sm:$0xff]   ;;  %v2460_v49 = vld [vmem:[%s2563_s15 + $0x240] ss:$20 sps:$4 sm:$0xff]   ;;  %v2462_v51 = vld [vmem:[%s2563_s15 + $0x268] ss:$20 sps:$4 sm:$0xff]  }
  0x44   : > { %2117 = vmatpush3.bf16.msra.mxu1 %v2372_v52 }
  0x47   : > { %1168 = vmatmul.mubr.bf16.gmra.mrb[16].mxu0 %v2378_v54  ;;  %1297 = vmatmul.mubr.bf16.vlgmr.msra.gmra.mrb[16].mxu1 %v2375_v53 }
  0x48   : > { %1175 = vmatprep.mubr.bf16.mxu0 %v2379_v55  ;;  %1304 = vmatprep.mubr.bf16.mxu1 %v2381_v57 }
  0x4f   : > { %1176 = vmatmul.mubr.bf16.gmra.mrb[20].mxu0 %v2383_v58  ;;  %1305 = vmatmul.mubr.bf16.gmra.mrb[20].mxu1 %v2384_v59 }
  0x50   : > { %1183 = vmatprep.mubr.bf16.mxu0 %v2385_v60  ;;  %1312 = vmatprep.mubr.bf16.mxu1 %v2387_v61 }
  0x57   : > { %1184 = vmatmul.mubr.bf16.gmra.mrb[24].mxu0 %v2389_v62  ;;  %1313 = vmatmul.mubr.bf16.gmra.mrb[24].mxu1 %v2390_v63 }
  0x58   : > { %1191 = vmatprep.mubr.bf16.mxu0 %v2392_v0  ;;  %1320 = vmatprep.mubr.bf16.mxu1 %v2394_v1 }
  0x5f   : > { %1192 = vmatmul.mubr.bf16.gmra.mrb[28].mxu0 %v2396_v2  ;;  %1321 = vmatmul.mubr.bf16.gmra.mrb[28].mxu1 %v2397_v3 }
  0x60   : > { %1199 = vmatprep.mubr.bf16.mxu0 %v2398_v4  ;;  %1328 = vmatprep.mubr.bf16.mxu1 %v2400_v5 }
  0x67   : > { %1200 = vmatmul.mubr.bf16.gmra.mrb[32].mxu0 %v2402_v6  ;;  %1329 = vmatmul.mubr.bf16.gmra.mrb[32].mxu1 %v2403_v7 }
  0x68   : > { %1207 = vmatprep.mubr.bf16.mxu0 %v2404_v8  ;;  %1336 = vmatprep.mubr.bf16.mxu1 %v2406_v9 }
  0x6f   : > { %1208 = vmatmul.mubr.bf16.gmra.mrb[36].mxu0 %v2408_v10  ;;  %1337 = vmatmul.mubr.bf16.gmra.mrb[36].mxu1 %v2409_v11 }
  0x70   : > { %1215 = vmatprep.mubr.bf16.mxu0 %v2411_v12  ;;  %1344 = vmatprep.mubr.bf16.mxu1 %v2413_v13 }
  0x77   : > { %1216 = vmatmul.mubr.bf16.gmra.mrb[40].mxu0 %v2415_v14  ;;  %1345 = vmatmul.mubr.bf16.gmra.mrb[40].mxu1 %v2416_v15 }
  0x78   : > { %1223 = vmatprep.mubr.bf16.mxu0 %v2417_v16  ;;  %1352 = vmatprep.mubr.bf16.mxu1 %v2419_v17 }
  0x7f   : > { %1224 = vmatmul.mubr.bf16.gmra.mrb[44].mxu0 %v2421_v18  ;;  %1353 = vmatmul.mubr.bf16.gmra.mrb[44].mxu1 %v2422_v19 }
  0x80   : > { %1360 = vmatprep.mubr.bf16.mxu1 %v2423_v20  ;;  %2242 = vmatprep.mubr.msk.bf16.mxu0 %vm1054_vm0, %v2425_v21 }
  0x87   : > { %1361 = vmatmul.mubr.bf16.gmra.mrb[48].mxu1 %v2426_v22  ;;  %2243 = vmatmul.mubr.msk.bf16.vlgmr.msra.gmra.mrb[48].mxu0 %vm1054_vm0, %v2427_v23 }
  0x88   : > { %1368 = vmatprep.mubr.bf16.mxu1 %v2428_v24  ;;  %2246 = vmatprep.mubr.msk.bf16.mxu0 %vm1054_vm0, %v2430_v25 }
  0x8f   : > { %1369 = vmatmul.mubr.bf16.gmra.mrb[52].mxu1 %v2431_v26  ;;  %2247 = vmatmul.mubr.msk.bf16.gmra.mrb[52].mxu0 %vm1054_vm0, %v2432_v27 }
  0x90   : > { %1376 = vmatprep.mubr.bf16.mxu1 %v2433_v28  ;;  %2250 = vmatprep.mubr.msk.bf16.mxu0 %vm1054_vm0, %v2435_v29 }
  0x97   : > { %1377 = vmatmul.mubr.bf16.gmra.mrb[56].mxu1 %v2436_v30  ;;  %2251 = vmatmul.mubr.msk.bf16.gmra.mrb[56].mxu0 %vm1054_vm0, %v2437_v31 }
  0x98   : > { %1384 = vmatprep.mubr.bf16.mxu1 %v2438_v32  ;;  %2254 = vmatprep.mubr.msk.bf16.mxu0 %vm1054_vm0, %v2440_v33 }
  0x9f   : > { %1385 = vmatmul.mubr.bf16.gmra.mrb[60].mxu1 %v2441_v34  ;;  %2255 = vmatmul.mubr.msk.bf16.gmra.mrb[60].mxu0 %vm1054_vm0, %v2442_v35 }
  0xa0   : > { %1392 = vmatprep.mubr.bf16.mxu1 %v2443_v36  ;;  %2258 = vmatprep.mubr.msk.bf16.mxu0 %vm1054_vm0, %v2445_v37 }
  0xa7   : > { %1393 = vmatmul.mubr.bf16.gmra.mrb[64].mxu1 %v2446_v38  ;;  %2259 = vmatmul.mubr.msk.bf16.gmra.mrb[64].mxu0 %vm1054_vm0, %v2447_v39 }
  0xa8   : > { %1400 = vmatprep.mubr.bf16.mxu1 %v2448_v40  ;;  %2262 = vmatprep.mubr.msk.bf16.mxu0 %vm1054_vm0, %v2450_v41 }
  0xaf   : > { %1401 = vmatmul.mubr.bf16.gmra.mrb[68].mxu1 %v2451_v42  ;;  %2263 = vmatmul.mubr.msk.bf16.gmra.mrb[68].mxu0 %vm1054_vm0, %v2452_v43 }
  0xb0   : > { %1408 = vmatprep.mubr.bf16.mxu1 %v2453_v44  ;;  %2266 = vmatprep.mubr.msk.bf16.mxu0 %vm1054_vm0, %v2455_v45 }
  0xb7   : > { %1409 = vmatmul.mubr.bf16.gmra.mrb[72].mxu1 %v2456_v46  ;;  %2267 = vmatmul.mubr.msk.bf16.gmra.mrb[72].mxu0 %vm1054_vm0, %v2457_v47 }
  0xb8   : > { %1416 = vmatprep.mubr.bf16.mxu1 %v2458_v48  ;;  %2270 = vmatprep.mubr.msk.bf16.mxu0 %vm1054_vm0, %v2460_v49 }
  0xbf   : > { %1417 = vmatmul.mubr.bf16.gmra.mrb[76].mxu1 %v2461_v50  ;;  %2271 = vmatmul.mubr.msk.bf16.gmra.mrb[76].mxu0 %vm1054_vm0, %v2462_v51 }
  0xfa   : > { %v2078_v52 = vpop.f32.mrb[0].mxu1  ;;  %v2006_v53 = vpop.f32.mrb[0].mxu0 }
  0xfb   : > { %v2079_v54 = vpop.f32.mrb[1].mxu1  ;;  %v2007_v55 = vpop.f32.mrb[1].mxu0 }
  0xfc   : > { %v2742_v56 = vadd.f32 %v2079_v54, %v2078_v52  ;;  %v2081_v57 = vpop.f32.mrb[2].mxu1  ;;  %v2008_v58 = vadd.f32 %v2007_v55, %v2006_v53  ;;  %v2009_v59 = vpop.f32.mrb[2].mxu0 }
  0xfd   : > { %v2082_v60 = vpop.f32.mrb[3].mxu1  ;;  %v2010_v61 = vpop.f32.mrb[3].mxu0 }
  0xfe   : > { %v2744_v62 = vadd.f32 %v2082_v60, %v2081_v57  ;;  %v2011_v63 = vadd.f32 %v2010_v61, %v2009_v59 }
 0x102   : > { %v2084_v0 = vpop.f32.mrb[4].mxu1  ;;  %v2012_v1 = vpop.f32.mrb[4].mxu0 }
 0x103   : > { %v2085_v2 = vpop.f32.mrb[5].mxu1  ;;  %v2013_v3 = vpop.f32.mrb[5].mxu0 }
 0x104   : > { %v2746_v4 = vadd.f32 %v2085_v2, %v2084_v0  ;;  %v2087_v5 = vpop.f32.mrb[6].mxu1  ;;  %v2014_v6 = vadd.f32 %v2013_v3, %v2012_v1  ;;  %v2015_v7 = vpop.f32.mrb[6].mxu0 }
 0x105   : > { %v2088_v8 = vpop.f32.mrb[7].mxu1  ;;  %v2016_v9 = vpop.f32.mrb[7].mxu0 }
 0x106   : > { %v2748_v10 = vadd.f32 %v2088_v8, %v2087_v5  ;;  %v2017_v11 = vadd.f32 %v2016_v9, %v2015_v7 }
 0x10a   : > { %v2090_v12 = vpop.f32.mrb[8].mxu1  ;;  %v2018_v13 = vpop.f32.mrb[8].mxu0 }
 0x10b   : > { %v2091_v14 = vpop.f32.mrb[9].mxu1  ;;  %v2019_v15 = vpop.f32.mrb[9].mxu0 }
 0x10c   : > { %v2750_v16 = vadd.f32 %v2091_v14, %v2090_v12  ;;  %v2093_v17 = vpop.f32.mrb[10].mxu1  ;;  %v2020_v18 = vadd.f32 %v2019_v15, %v2018_v13  ;;  %v2021_v19 = vpop.f32.mrb[10].mxu0 }
 0x10d   : > { %v2094_v20 = vpop.f32.mrb[11].mxu1  ;;  %v2022_v21 = vpop.f32.mrb[11].mxu0 }
 0x10e   : > { %v2752_v22 = vadd.f32 %v2094_v20, %v2093_v17  ;;  %v2023_v23 = vadd.f32 %v2022_v21, %v2021_v19 }
 0x112   : > { %v2096_v24 = vpop.f32.mrb[12].mxu1  ;;  %v2024_v25 = vpop.f32.mrb[12].mxu0 }
 0x113   : > { %v2097_v26 = vpop.f32.mrb[13].mxu1  ;;  %v2025_v27 = vpop.f32.mrb[13].mxu0 }
 0x114   : > { %v2754_v28 = vadd.f32 %v2097_v26, %v2096_v24  ;;  %v2099_v29 = vpop.f32.mrb[14].mxu1  ;;  %v2026_v30 = vadd.f32 %v2025_v27, %v2024_v25  ;;  %v2027_v31 = vpop.f32.mrb[14].mxu0 }
 0x115   : > { %v2100_v32 = vpop.f32.mrb[15].mxu1  ;;  %v2028_v33 = vpop.f32.mrb[15].mxu0 }
 0x116   : > { %v2756_v34 = vadd.f32 %v2100_v32, %v2099_v29  ;;  %v2029_v35 = vadd.f32 %v2028_v33, %v2027_v31 }
 0x11a   : > { %v2118_v36 = vpop.f32.mrb[16].mxu1  ;;  %v2030_v37 = vpop.f32.mrb[16].mxu0 }
 0x11b   : > { %v2119_v38 = vpop.f32.mrb[17].mxu1  ;;  %v2031_v39 = vpop.f32.mrb[17].mxu0 }
 0x11c   : > { %v2120_v40 = vadd.f32 %v2119_v38, %v2118_v36  ;;  %v2121_v41 = vpop.f32.mrb[18].mxu1  ;;  %v2032_v42 = vadd.f32 %v2031_v39, %v2030_v37  ;;  %v2033_v43 = vpop.f32.mrb[18].mxu0 }
 0x11d   : > { %v2122_v44 = vpop.f32.mrb[19].mxu1  ;;  %v2034_v45 = vpop.f32.mrb[19].mxu0 }
 0x11e   : > { %v2123_v46 = vadd.f32 %v2122_v44, %v2121_v41  ;;  %v2035_v47 = vadd.f32 %v2034_v45, %v2033_v43  ;;  %v2758_v48 = vadd.f32 %v2120_v40, %v2008_v58 }
 0x120   : > { %v2760_v49 = vadd.f32 %v2123_v46, %v2011_v63 }
 0x122   : > { %v2124_v50 = vpop.f32.mrb[20].mxu1  ;;  %v2036_v51 = vpop.f32.mrb[20].mxu0 }
 0x123   : > { %v2125_v52 = vpop.f32.mrb[21].mxu1  ;;  %v2037_v53 = vpop.f32.mrb[21].mxu0 }
 0x124   : > { %v2126_v54 = vadd.f32 %v2125_v52, %v2124_v50  ;;  %v2127_v55 = vpop.f32.mrb[22].mxu1  ;;  %v2038_v57 = vadd.f32 %v2037_v53, %v2036_v51  ;;  %v2039_v59 = vpop.f32.mrb[22].mxu0 }
 0x125   : > { %v2128_v60 = vpop.f32.mrb[23].mxu1  ;;  %v2040_v61 = vpop.f32.mrb[23].mxu0 }
 0x126   : > { %v2129_v0 = vadd.f32 %v2128_v60, %v2127_v55  ;;  %v2041_v1 = vadd.f32 %v2040_v61, %v2039_v59  ;;  %v2762_v2 = vadd.f32 %v2126_v54, %v2014_v6 }
 0x128   : > { %v2764_v3 = vadd.f32 %v2129_v0, %v2017_v11 }
 0x12a   : > { %v2130_v58 = vpop.f32.mrb[24].mxu1  ;;  %v2042_v5 = vpop.f32.mrb[24].mxu0 }
 0x12b   : > { %v2131_v63 = vpop.f32.mrb[25].mxu1  ;;  %v2043_v7 = vpop.f32.mrb[25].mxu0 }
 0x12c   : > { %v2132_v8 = vadd.f32 %v2131_v63, %v2130_v58  ;;  %v2133_v9 = vpop.f32.mrb[26].mxu1  ;;  %v2044_v12 = vadd.f32 %v2043_v7, %v2042_v5  ;;  %v2045_v13 = vpop.f32.mrb[26].mxu0 }
 0x12d   : > { %v2134_v14 = vpop.f32.mrb[27].mxu1  ;;  %v2046_v15 = vpop.f32.mrb[27].mxu0 }
 0x12e   : > { %v2135_v17 = vadd.f32 %v2134_v14, %v2133_v9  ;;  %v2047_v19 = vadd.f32 %v2046_v15, %v2045_v13  ;;  %v2766_v20 = vadd.f32 %v2132_v8, %v2020_v18 }
 0x130   : > { %v2768_v21 = vadd.f32 %v2135_v17, %v2023_v23 }
 0x132   : > { %v2136_v6 = vpop.f32.mrb[28].mxu1  ;;  %v2048_v24 = vpop.f32.mrb[28].mxu0 }
 0x133   : > { %v2137_v11 = vpop.f32.mrb[29].mxu1  ;;  %v2049_v25 = vpop.f32.mrb[29].mxu0 }
 0x134   : > { %v2138_v26 = vadd.f32 %v2137_v11, %v2136_v6  ;;  %v2139_v27 = vpop.f32.mrb[30].mxu1  ;;  %v2050_v29 = vadd.f32 %v2049_v25, %v2048_v24  ;;  %v2051_v31 = vpop.f32.mrb[30].mxu0 }
 0x135   : > { %v2140_v32 = vpop.f32.mrb[31].mxu1  ;;  %v2052_v33 = vpop.f32.mrb[31].mxu0 }
 0x136   : > { %v2141_v36 = vadd.f32 %v2140_v32, %v2139_v27  ;;  %v2053_v37 = vadd.f32 %v2052_v33, %v2051_v31  ;;  %v2770_v38 = vadd.f32 %v2138_v26, %v2026_v30 }
 0x138   : > { %v2772_v39 = vadd.f32 %v2141_v36, %v2029_v35 }
 0x13a   : > { %v2142_v18 = vpop.f32.mrb[32].mxu1  ;;  %v2054_v40 = vpop.f32.mrb[32].mxu0 }
 0x13b   : > { %v2143_v23 = vpop.f32.mrb[33].mxu1  ;;  %v2055_v41 = vpop.f32.mrb[33].mxu0 }
 0x13c   : > { %v2144_v43 = vadd.f32 %v2143_v23, %v2142_v18  ;;  %v2145_v44 = vpop.f32.mrb[34].mxu1  ;;  %v2774_v45 = vadd.f32 %v2055_v41, %v2054_v40  ;;  %v2057_v46 = vpop.f32.mrb[34].mxu0 }
 0x13d   : > { %v2146_v50 = vpop.f32.mrb[35].mxu1  ;;  %v2058_v51 = vpop.f32.mrb[35].mxu0 }
 0x13e   : > { %v2147_v52 = vadd.f32 %v2146_v50, %v2145_v44  ;;  %v2776_v53 = vadd.f32 %v2058_v51, %v2057_v46  ;;  %v2778_v54 = vadd.f32 %v2144_v43, %v2032_v42 }
 0x140   : > { %v2780_v30 = vadd.f32 %v2147_v52, %v2035_v47 }
 0x142   : > { %v2148_v35 = vpop.f32.mrb[36].mxu1  ;;  %v2060_v55 = vpop.f32.mrb[36].mxu0 }
 0x143   : > { %v2149_v59 = vpop.f32.mrb[37].mxu1  ;;  %v2061_v60 = vpop.f32.mrb[37].mxu0 }
 0x144   : > { %v2150_v61 = vadd.f32 %v2149_v59, %v2148_v35  ;;  %v2151_v0 = vpop.f32.mrb[38].mxu1  ;;  %v2782_v58 = vadd.f32 %v2061_v60, %v2060_v55  ;;  %v2063_v5 = vpop.f32.mrb[38].mxu0  ;;  %v2809_v59 = vld [vmem:[%s2979_s2] ss:$0 sm:$0xff] }
 0x145   : > { %v2152_v63 = vpop.f32.mrb[39].mxu1  ;;  %v2064_v7 = vpop.f32.mrb[39].mxu0 }
 0x146   : > { %v2153_v8 = vadd.f32 %v2152_v63, %v2151_v0  ;;  %v2784_v9 = vadd.f32 %v2064_v7, %v2063_v5  ;;  %v2786_v13 = vadd.f32 %v2150_v61, %v2038_v57  ;;  %v2815_v5 = vld [vmem:[%s2980_s3] ss:$0 sm:$0xff] }
 0x148   : > { %v2788_v42 = vadd.f32 %v2153_v8, %v2041_v1 }
 0x14a   : > { %v2154_v47 = vpop.f32.mrb[40].mxu1  ;;  %v2066_v14 = vpop.f32.mrb[40].mxu0 }
 0x14b   : > { %v2155_v15 = vpop.f32.mrb[41].mxu1  ;;  %v2067_v17 = vpop.f32.mrb[41].mxu0 }
 0x14c   : > { %v2156_v6 = vadd.f32 %v2155_v15, %v2154_v47  ;;  %v2157_v24 = vpop.f32.mrb[42].mxu1  ;;  %v2790_v11 = vadd.f32 %v2067_v17, %v2066_v14  ;;  %v2069_v25 = vpop.f32.mrb[42].mxu0 }
 0x14d   : > { %v2158_v26 = vpop.f32.mrb[43].mxu1  ;;  %v2070_v27 = vpop.f32.mrb[43].mxu0 }
 0x14e   : > { %v2159_v31 = vadd.f32 %v2158_v26, %v2157_v24  ;;  %v2792_v32 = vadd.f32 %v2070_v27, %v2069_v25  ;;  %v2794_v33 = vadd.f32 %v2156_v6, %v2044_v12 }
 0x150   : > { %v2796_v57 = vadd.f32 %v2159_v31, %v2047_v19 }
 0x152   : > { %v2160_v1 = vpop.f32.mrb[44].mxu1  ;;  %v2072_v36 = vpop.f32.mrb[44].mxu0 }
 0x153   : > { %v2161_v18 = vpop.f32.mrb[45].mxu1  ;;  %v2073_v40 = vpop.f32.mrb[45].mxu0 }
 0x154   : > { %v2162_v23 = vadd.f32 %v2161_v18, %v2160_v1  ;;  %v2163_v41 = vpop.f32.mrb[46].mxu1  ;;  %v2798_v43 = vadd.f32 %v2073_v40, %v2072_v36  ;;  %v2075_v44 = vpop.f32.mrb[46].mxu0 }
 0x155   : > { %v2164_v46 = vpop.f32.mrb[47].mxu1  ;;  %v2076_v50 = vpop.f32.mrb[47].mxu0 }
 0x156   : > { %v2165_v51 = vadd.f32 %v2164_v46, %v2163_v41  ;;  %v2800_v52 = vadd.f32 %v2076_v50, %v2075_v44  ;;  %v2802_v35 = vadd.f32 %v2162_v23, %v2050_v29 }
 0x158   : > { %v2804_v12 = vadd.f32 %v2165_v51, %v2053_v37 }
 0x15a   : > { %v2166_v19 = vpop.f32.mrb[48].mxu1  ;;  %v2244_v55 = vpop.f32.mrb[48].mxu0 }
 0x15b   : > { %v1468_v60 = vadd.f32 %v2244_v55, %v2762_v2  ;;  %v2167_v61 = vpop.f32.mrb[49].mxu1  ;;  %v1459_v0 = vpop.f32.mrb[49].mxu0 }
 0x15c   : > { %v2168_v29 = vadd.f32 %v2167_v61, %v2166_v19  ;;  %v1460_v37 = vadd.f32 %v1459_v0, %v2758_v48  ;;  %v2169_v63 = vpop.f32.mrb[50].mxu1  ;;  %v2245_v7 = vpop.f32.mrb[50].mxu0 }
 0x15d   : > { %v1595_v8 = vmul.f32 %v2809_v59, %v1468_v60  ;;  %v1471_v47 = vadd.f32 %v2245_v7, %v2764_v3  ;;  %v2170_v14 = vpop.f32.mrb[51].mxu1  ;;  %v1462_v15 = vpop.f32.mrb[51].mxu0 }
 0x15e   : > { %v1593_v2 = vmul.f32 %v2809_v59, %v1460_v37  ;;  %v2171_v17 = vadd.f32 %v2170_v14, %v2169_v63  ;;  %v1463_v6 = vadd.f32 %v1462_v15, %v2760_v49  ;;  %v2824_v24 = vadd.f32 %v2168_v29, %v2774_v45 }
 0x15f   : > { %v1634_v25 = vadd.f32 %v2815_v5, %v1595_v8  ;;  %v1596_v48 = vmul.f32 %v2809_v59, %v1471_v47 }
 0x160   : > { %v1632_v3 = vadd.f32 %v2815_v5, %v1593_v2  ;;  %v1594_v26 = vmul.f32 %v2809_v59, %v1463_v6  ;;  %v2836_v49 = vadd.f32 %v2171_v17, %v2776_v53 }
 0x161   : > { %v1666_v45 = vmax.f32 %v1634_v25, 0.0  ;;  %v1635_v27 = vadd.f32 %v2815_v5, %v1596_v48 }
 0x162   : > { %v1664_v31 = vmax.f32 %v1632_v3, 0.0  ;;  %v1633_v1 = vadd.f32 %v2815_v5, %v1594_v26  ;;  %v2172_v36 = vpop.f32.mrb[52].mxu1  ;;  %v2248_v18 = vpop.f32.mrb[52].mxu0 }
 0x163   : > { %1698 = vst [vmem:[%s2831_s11 + $0x10] sm:$0xff] %v1666_v45  ;;  %v1667_v40 = vmax.f32 %v1635_v27, 0.0  ;;  %v1484_v23 = vadd.f32 %v2248_v18, %v2770_v38  ;;  %v2173_v41 = vpop.f32.mrb[53].mxu1  ;;  %v1475_v44 = vpop.f32.mrb[53].mxu0 }
 0x164   : > { %1696 = vst [vmem:[%s2831_s11] sm:$0xff] %v1664_v31  ;;  %v1665_v46 = vmax.f32 %v1633_v1, 0.0  ;;  %v2174_v53 = vadd.f32 %v2173_v41, %v2172_v36  ;;  %v1476_v50 = vadd.f32 %v1475_v44, %v2766_v20  ;;  %v2175_v51 = vpop.f32.mrb[54].mxu1  ;;  %v2249_v19 = vpop.f32.mrb[54].mxu0 }
 0x165   : > { %1699 = vst [vmem:[%s2831_s11 + $0x18] sm:$0xff] %v1667_v40  ;;  %v1599_v55 = vmul.f32 %v2809_v59, %v1484_v23  ;;  %v1487_v60 = vadd.f32 %v2249_v19, %v2772_v39  ;;  %v2176_v61 = vpop.f32.mrb[55].mxu1  ;;  %v1478_v0 = vpop.f32.mrb[55].mxu0 }
 0x166   : > { %1697 = vst [vmem:[%s2831_s11 + $0x8] sm:$0xff] %v1665_v46  ;;  %v1597_v38 = vmul.f32 %v2809_v59, %v1476_v50  ;;  %v2177_v29 = vadd.f32 %v2176_v61, %v2175_v51  ;;  %v1479_v37 = vadd.f32 %v1478_v0, %v2768_v21  ;;  %v2851_v63 = vadd.f32 %v2174_v53, %v2782_v58 }
 0x167   : > { %v1638_v20 = vadd.f32 %v2815_v5, %v1599_v55  ;;  %v1600_v7 = vmul.f32 %v2809_v59, %v1487_v60 }
 0x168   : > { %v1636_v8 = vadd.f32 %v2815_v5, %v1597_v38  ;;  %v1598_v39 = vmul.f32 %v2809_v59, %v1479_v37  ;;  %v2858_v47 = vadd.f32 %v2177_v29, %v2784_v9 }
 0x169   : > { %v1670_v14 = vmax.f32 %v1638_v20, 0.0  ;;  %v1639_v15 = vadd.f32 %v2815_v5, %v1600_v7 }
 0x16a   : > { %v1668_v21 = vmax.f32 %v1636_v8, 0.0  ;;  %v1637_v58 = vadd.f32 %v2815_v5, %v1598_v39  ;;  %v2178_v2 = vpop.f32.mrb[56].mxu1  ;;  %v2252_v17 = vpop.f32.mrb[56].mxu0 }
 0x16b   : > { %1702 = vst [vmem:[%s2831_s11 + $0x30] sm:$0xff] %v1670_v14  ;;  %v1671_v6 = vmax.f32 %v1639_v15, 0.0  ;;  %v1500_v25 = vadd.f32 %v2252_v17, %v2786_v13  ;;  %v2179_v48 = vpop.f32.mrb[57].mxu1  ;;  %v1491_v3 = vpop.f32.mrb[57].mxu0 }
 0x16c   : > { %1700 = vst [vmem:[%s2831_s11 + $0x20] sm:$0xff] %v1668_v21  ;;  %v1669_v26 = vmax.f32 %v1637_v58, 0.0  ;;  %v2180_v9 = vadd.f32 %v2179_v48, %v2178_v2  ;;  %v1492_v45 = vadd.f32 %v1491_v3, %v2778_v54  ;;  %v2181_v27 = vpop.f32.mrb[58].mxu1  ;;  %v2253_v31 = vpop.f32.mrb[58].mxu0 }
 0x16d   : > { %1703 = vst [vmem:[%s2831_s11 + $0x38] sm:$0xff] %v1671_v6  ;;  %v1603_v1 = vmul.f32 %v2809_v59, %v1500_v25  ;;  %v1503_v36 = vadd.f32 %v2253_v31, %v2788_v42  ;;  %v2182_v18 = vpop.f32.mrb[59].mxu1  ;;  %v1494_v40 = vpop.f32.mrb[59].mxu0 }
 0x16e   : > { %1701 = vst [vmem:[%s2831_s11 + $0x28] sm:$0xff] %v1669_v26  ;;  %v1601_v13 = vmul.f32 %v2809_v59, %v1492_v45  ;;  %v2183_v23 = vadd.f32 %v2182_v18, %v2181_v27  ;;  %v1495_v41 = vadd.f32 %v1494_v40, %v2780_v30  ;;  %v2873_v44 = vadd.f32 %v2180_v9, %v2790_v11 }
 0x16f   : > { %v1642_v54 = vadd.f32 %v2815_v5, %v1603_v1  ;;  %v1604_v46 = vmul.f32 %v2809_v59, %v1503_v36 }
 0x170   : > { %v1640_v53 = vadd.f32 %v2815_v5, %v1601_v13  ;;  %v1602_v42 = vmul.f32 %v2809_v59, %v1495_v41  ;;  %v2880_v50 = vadd.f32 %v2183_v23, %v2792_v32 }
 0x171   : > { %v1674_v51 = vmax.f32 %v1642_v54, 0.0  ;;  %v1643_v19 = vadd.f32 %v2815_v5, %v1604_v46 }
 0x172   : > { %v1672_v30 = vmax.f32 %v1640_v53, 0.0  ;;  %v1641_v11 = vadd.f32 %v2815_v5, %v1602_v42  ;;  %v2184_v55 = vpop.f32.mrb[60].mxu1  ;;  %v2256_v60 = vpop.f32.mrb[60].mxu0 }
 0x173   : > { %1706 = vst [vmem:[%s2831_s11 + $0x50] sm:$0xff] %v1674_v51  ;;  %v1675_v61 = vmax.f32 %v1643_v19, 0.0  ;;  %v1516_v0 = vadd.f32 %v2256_v60, %v2802_v35  ;;  %v2185_v38 = vpop.f32.mrb[61].mxu1  ;;  %v1507_v29 = vpop.f32.mrb[61].mxu0 }
 0x174   : > { %1704 = vst [vmem:[%s2831_s11 + $0x40] sm:$0xff] %v1672_v30  ;;  %v1673_v37 = vmax.f32 %v1641_v11, 0.0  ;;  %v2186_v32 = vadd.f32 %v2185_v38, %v2184_v55  ;;  %v1508_v20 = vadd.f32 %v1507_v29, %v2794_v33  ;;  %v2187_v7 = vpop.f32.mrb[62].mxu1  ;;  %v2257_v8 = vpop.f32.mrb[62].mxu0 }
 0x175   : > { %1707 = vst [vmem:[%s2831_s11 + $0x58] sm:$0xff] %v1675_v61  ;;  %v1607_v39 = vmul.f32 %v2809_v59, %v1516_v0  ;;  %v1519_v14 = vadd.f32 %v2257_v8, %v2804_v12  ;;  %v2188_v15 = vpop.f32.mrb[63].mxu1  ;;  %v1510_v21 = vpop.f32.mrb[63].mxu0 }
 0x176   : > { %1705 = vst [vmem:[%s2831_s11 + $0x48] sm:$0xff] %v1673_v37  ;;  %v1605_v35 = vmul.f32 %v2809_v59, %v1508_v20  ;;  %v2189_v58 = vadd.f32 %v2188_v15, %v2187_v7  ;;  %v1511_v2 = vadd.f32 %v1510_v21, %v2796_v57  ;;  %v1387_v17 = vadd.f32 %v2186_v32, %v2798_v43 }
 0x177   : > { %v1646_v33 = vadd.f32 %v2815_v5, %v1607_v39  ;;  %v1608_v6 = vmul.f32 %v2809_v59, %v1519_v14 }
 0x178   : > { %v1644_v25 = vadd.f32 %v2815_v5, %v1605_v35  ;;  %v1606_v12 = vmul.f32 %v2809_v59, %v1511_v2  ;;  %v1390_v48 = vadd.f32 %v2189_v58, %v2800_v52 }
 0x179   : > { %v1678_v3 = vmax.f32 %v1646_v33, 0.0  ;;  %v1647_v26 = vadd.f32 %v2815_v5, %v1608_v6 }
 0x17a   : > { %v1676_v9 = vmax.f32 %v1644_v25, 0.0  ;;  %v1645_v57 = vadd.f32 %v2815_v5, %v1606_v12  ;;  %v2190_v45 = vpop.f32.mrb[64].mxu1  ;;  %v2260_v43 = vpop.f32.mrb[64].mxu0 }
 0x17b   : > { %1710 = vst [vmem:[%s2831_s11 + $0x70] sm:$0xff] %v1678_v3  ;;  %v1679_v27 = vmax.f32 %v1647_v26, 0.0  ;;  %v1532_v31 = vadd.f32 %v2260_v43, %v2851_v63  ;;  %v2191_v1 = vpop.f32.mrb[65].mxu1  ;;  %v1523_v36 = vpop.f32.mrb[65].mxu0 }
 0x17c   : > { %1708 = vst [vmem:[%s2831_s11 + $0x60] sm:$0xff] %v1676_v9  ;;  %v1677_v18 = vmax.f32 %v1645_v57, 0.0  ;;  %v2192_v40 = vadd.f32 %v2191_v1, %v2190_v45  ;;  %v1524_v52 = vadd.f32 %v1523_v36, %v2824_v24  ;;  %v2193_v13 = vpop.f32.mrb[66].mxu1  ;;  %v2261_v23 = vpop.f32.mrb[66].mxu0 }
 0x17d   : > { %1711 = vst [vmem:[%s2831_s11 + $0x78] sm:$0xff] %v1679_v27  ;;  %v1611_v41 = vmul.f32 %v2809_v59, %v1532_v31  ;;  %v1535_v54 = vadd.f32 %v2261_v23, %v2858_v47  ;;  %v2194_v46 = vpop.f32.mrb[67].mxu1  ;;  %v1526_v53 = vpop.f32.mrb[67].mxu0 }
 0x17e   : > { %1709 = vst [vmem:[%s2831_s11 + $0x68] sm:$0xff] %v1677_v18  ;;  %v1609_v63 = vmul.f32 %v2809_v59, %v1524_v52  ;;  %v2195_v42 = vadd.f32 %v2194_v46, %v2193_v13  ;;  %v1527_v51 = vadd.f32 %v1526_v53, %v2836_v49  ;;  %v1395_v19 = vadd.f32 %v2192_v40, %v2742_v56 }
 0x17f   : > { %v1650_v24 = vadd.f32 %v2815_v5, %v1611_v41  ;;  %v1612_v30 = vmul.f32 %v2809_v59, %v1535_v54 }
 0x180   : > { %v1648_v11 = vadd.f32 %v2815_v5, %v1609_v63  ;;  %v1610_v47 = vmul.f32 %v2809_v59, %v1527_v51  ;;  %v1398_v55 = vadd.f32 %v2195_v42, %v2744_v62 }
 0x181   : > { %v1682_v60 = vmax.f32 %v1650_v24, 0.0  ;;  %v1651_v61 = vadd.f32 %v2815_v5, %v1612_v30 }
 0x182   : > { %v1680_v0 = vmax.f32 %v1648_v11, 0.0  ;;  %v1649_v49 = vadd.f32 %v2815_v5, %v1610_v47  ;;  %v2196_v38 = vpop.f32.mrb[68].mxu1  ;;  %v2264_v56 = vpop.f32.mrb[68].mxu0 }
 0x183   : > { %1714 = vst [vmem:[%s2831_s11 + $0x90] sm:$0xff] %v1682_v60  ;;  %v1683_v29 = vmax.f32 %v1651_v61, 0.0  ;;  %v1548_v37 = vadd.f32 %v2264_v56, %v1387_v17  ;;  %v2197_v32 = vpop.f32.mrb[69].mxu1  ;;  %v1539_v20 = vpop.f32.mrb[69].mxu0 }
 0x184   : > { %1712 = vst [vmem:[%s2831_s11 + $0x80] sm:$0xff] %v1680_v0  ;;  %v1681_v7 = vmax.f32 %v1649_v49, 0.0  ;;  %v2198_v8 = vadd.f32 %v2197_v32, %v2196_v38  ;;  %v1540_v62 = vadd.f32 %v1539_v20, %v2873_v44  ;;  %v2199_v39 = vpop.f32.mrb[70].mxu1  ;;  %v2265_v14 = vpop.f32.mrb[70].mxu0 }
 0x185   : > { %1715 = vst [vmem:[%s2831_s11 + $0x98] sm:$0xff] %v1683_v29  ;;  %v1615_v15 = vmul.f32 %v2809_v59, %v1548_v37  ;;  %v1551_v21 = vadd.f32 %v2265_v14, %v1390_v48  ;;  %v2200_v35 = vpop.f32.mrb[71].mxu1  ;;  %v1542_v58 = vpop.f32.mrb[71].mxu0 }
 0x186   : > { %1713 = vst [vmem:[%s2831_s11 + $0x88] sm:$0xff] %v1681_v7  ;;  %v1613_v2 = vmul.f32 %v2809_v59, %v1540_v62  ;;  %v2201_v17 = vadd.f32 %v2200_v35, %v2199_v39  ;;  %v1543_v33 = vadd.f32 %v1542_v58, %v2880_v50  ;;  %v1403_v6 = vadd.f32 %v2198_v8, %v2746_v4 }
 0x187   : > { %v1654_v25 = vadd.f32 %v2815_v5, %v1615_v15  ;;  %v1616_v44 = vmul.f32 %v2809_v59, %v1551_v21 }
 0x188   : > { %v1652_v12 = vadd.f32 %v2815_v5, %v1613_v2  ;;  %v1614_v48 = vmul.f32 %v2809_v59, %v1543_v33  ;;  %v1406_v3 = vadd.f32 %v2201_v17, %v2748_v10 }
 0x189   : > { %v1686_v26 = vmax.f32 %v1654_v25, 0.0  ;;  %v1655_v9 = vadd.f32 %v2815_v5, %v1616_v44 }
 0x18a   : > { %v1684_v57 = vmax.f32 %v1652_v12, 0.0  ;;  %v1653_v50 = vadd.f32 %v2815_v5, %v1614_v48  ;;  %v2202_v45 = vpop.f32.mrb[72].mxu1  ;;  %v2268_v4 = vpop.f32.mrb[72].mxu0 }
 0x18b   : > { %1718 = vst [vmem:[%s2831_s11 + $0xb0] sm:$0xff] %v1686_v26  ;;  %v1687_v43 = vmax.f32 %v1655_v9, 0.0  ;;  %v1564_v27 = vadd.f32 %v2268_v4, %v1403_v6  ;;  %v2203_v31 = vpop.f32.mrb[73].mxu1  ;;  %v1555_v1 = vpop.f32.mrb[73].mxu0 }
 0x18c   : > { %1716 = vst [vmem:[%s2831_s11 + $0xa0] sm:$0xff] %v1684_v57  ;;  %v1685_v36 = vmax.f32 %v1653_v50, 0.0  ;;  %v2204_v18 = vadd.f32 %v2203_v31, %v2202_v45  ;;  %v1556_v40 = vadd.f32 %v1555_v1, %v1395_v19  ;;  %v2205_v10 = vpop.f32.mrb[74].mxu1  ;;  %v2269_v52 = vpop.f32.mrb[74].mxu0 }
 0x18d   : > { %1719 = vst [vmem:[%s2831_s11 + $0xb8] sm:$0xff] %v1687_v43  ;;  %v1619_v13 = vmul.f32 %v2809_v59, %v1564_v27  ;;  %v1567_v23 = vadd.f32 %v2269_v52, %v1406_v3  ;;  %v2206_v41 = vpop.f32.mrb[75].mxu1  ;;  %v1558_v54 = vpop.f32.mrb[75].mxu0 }
 0x18e   : > { %1717 = vst [vmem:[%s2831_s11 + $0xa8] sm:$0xff] %v1685_v36  ;;  %v1617_v46 = vmul.f32 %v2809_v59, %v1556_v40  ;;  %v2207_v53 = vadd.f32 %v2206_v41, %v2205_v10  ;;  %v1559_v63 = vadd.f32 %v1558_v54, %v1398_v55  ;;  %v1411_v42 = vadd.f32 %v2204_v18, %v2750_v16 }
 0x18f   : > { %v1658_v51 = vadd.f32 %v2815_v5, %v1619_v13  ;;  %v1620_v19 = vmul.f32 %v2809_v59, %v1567_v23 }
 0x190   : > { %v1656_v24 = vadd.f32 %v2815_v5, %v1617_v46  ;;  %v1618_v30 = vmul.f32 %v2809_v59, %v1559_v63  ;;  %v1414_v11 = vadd.f32 %v2207_v53, %v2752_v22 }
 0x191   : > { %v1690_v47 = vmax.f32 %v1658_v51, 0.0  ;;  %v1659_v60 = vadd.f32 %v2815_v5, %v1620_v19 }
 0x192   : > { %v1688_v61 = vmax.f32 %v1656_v24, 0.0  ;;  %v1657_v55 = vadd.f32 %v2815_v5, %v1618_v30  ;;  %v2208_v16 = vpop.f32.mrb[76].mxu1  ;;  %v2272_v0 = vpop.f32.mrb[76].mxu0 }
 0x193   : > { %1722 = vst [vmem:[%s2831_s11 + $0xd0] sm:$0xff] %v1690_v47  ;;  %v1691_v49 = vmax.f32 %v1659_v60, 0.0  ;;  %v2209_v38 = vpop.f32.mrb[77].mxu1  ;;  %v1571_v56 = vpop.f32.mrb[77].mxu0 }
 0x194   : > { %1720 = vst [vmem:[%s2831_s11 + $0xc0] sm:$0xff] %v1688_v61  ;;  %v1689_v29 = vmax.f32 %v1657_v55, 0.0  ;;  %v2210_v37 = vadd.f32 %v2209_v38, %v2208_v16  ;;  %v1572_v32 = vadd.f32 %v1571_v56, %v1411_v42  ;;  %v2211_v20 = vpop.f32.mrb[78].mxu1  ;;  %v2273_v22 = vpop.f32.mrb[78].mxu0 }
 0x195   : > { %1723 = vst [vmem:[%s2831_s11 + $0xd8] sm:$0xff] %v1691_v49  ;;  %v2212_v7 = vpop.f32.mrb[79].mxu1  ;;  %v1574_v8 = vpop.f32.mrb[79].mxu0 }
 0x196   : > { %1721 = vst [vmem:[%s2831_s11 + $0xc8] sm:$0xff] %v1689_v29  ;;  %v1419_v62 = vadd.f32 %v2210_v37, %v2754_v28  ;;  %v1621_v39 = vmul.f32 %v2809_v59, %v1572_v32  ;;  %v2213_v14 = vadd.f32 %v2212_v7, %v2211_v20  ;;  %v1575_v15 = vadd.f32 %v1574_v8, %v1414_v11 }
 0x198   : > { %v1580_v21 = vadd.f32 %v2272_v0, %v1419_v62  ;;  %v1660_v35 = vadd.f32 %v2815_v5, %v1621_v39  ;;  %v1422_v58 = vadd.f32 %v2213_v14, %v2756_v34  ;;  %v1622_v2 = vmul.f32 %v2809_v59, %v1575_v15 }
 0x19a   : > { %v1623_v17 = vmul.f32 %v2809_v59, %v1580_v21  ;;  %v1692_v33 = vmax.f32 %v1660_v35, 0.0  ;;  %v1583_v6 = vadd.f32 %v2273_v22, %v1422_v58  ;;  %v1661_v28 = vadd.f32 %v2815_v5, %v1622_v2 }
 0x19c   : > { %v1662_v25 = vadd.f32 %v2815_v5, %v1623_v17  ;;  %1724 = vst [vmem:[%s2831_s11 + $0xe0] sm:$0xff] %v1692_v33  ;;  %v1624_v44 = vmul.f32 %v2809_v59, %v1583_v6  ;;  %v1693_v12 = vmax.f32 %v1661_v28, 0.0 }
 0x19e   : > { %v1694_v48 = vmax.f32 %v1662_v25, 0.0  ;;  %v1663_v3 = vadd.f32 %v2815_v5, %v1624_v44  ;;  %1725 = vst [vmem:[%s2831_s11 + $0xe8] sm:$0xff] %v1693_v12 }
 0x1a0   : > { %1726 = vst [vmem:[%s2831_s11 + $0xf0] sm:$0xff] %v1694_v48  ;;  %v1695_v34 = vmax.f32 %v1663_v3, 0.0 }
 0x1a2   : > { %1727 = vst [vmem:[%s2831_s11 + $0xf8] sm:$0xff] %v1695_v34 }
 0x1a3 PF: > { %s14_s17 = sadd.s32 1, %s2485_s17   ;;  %s2982_s15 = smov %s2481_s16 }
 0x1a4   : > { %p11_p5 = scmp.ge.s32.totalorder %s14_s17, 4   ;;  %s2983_s16 = smov %s2985_s18 }
 0x1a6   :  { %13 = sbr.rel (!%p11_p5) target bundleno = 2 (0x2), region = 75 }

</bundles_post_ra>
